<compile_context>
chip_gen: v5e
topology: v5e:2x2
jax: 0.10.0
libtpu: 0.0.40
codegen_flags: <defaults>
</compile_context>

<pallas_src>
import functools

import jax
import jax.numpy as jnp
from jax.experimental import pallas as pl
from jax.experimental.pallas import tpu as pltpu

EPS = 1e-5


# ----------------------------------------------------------------------------
# Kernels
# ----------------------------------------------------------------------------
def _conv1x1_stats_kernel(*refs, apply_pre_bn):
    """1x1 conv (+ optional fused previous-BN+ReLU) + per-channel sum/sumsq."""
    if apply_pre_bn:
        x_ref, scale_ref, shift_ref, w_ref, y_ref, stats_ref = refs
    else:
        x_ref, w_ref, y_ref, stats_ref = refs

    i = pl.program_id(1)                      # H-tile index (stats accumulation axis)
    _, TH, W, Cin = x_ref.shape
    Cout = w_ref.shape[1]
    m = TH * W

    x = x_ref[...].reshape(m, Cin).astype(jnp.float32)
    if apply_pre_bn:
        # Fold the previous layer's BN + ReLU into the bf16 downcast feeding
        # this matmul (one fewer full pass over the activation).
        x = jnp.maximum(x * scale_ref[...] + shift_ref[...], 0.0)

    y = jnp.dot(x.astype(jnp.bfloat16), w_ref[...],
                preferred_element_type=jnp.float32)            # (m, Cout) f32

    @pl.when(i == 0)
    def _init():
        stats_ref[...] = jnp.zeros_like(stats_ref)

    # TODO(synk): one-pass E[x^2]-E[x]^2 can cancel when |mean| >> std; switch
    # to a per-tile Welford merge if that regime shows up.
    stats_ref[...] += jnp.concatenate(
        [jnp.sum(y, axis=0, keepdims=True),
         jnp.sum(y * y, axis=0, keepdims=True)], axis=0).reshape(1, 2, Cout)

    y_ref[...] = y.astype(y_ref.dtype).reshape(1, TH, W, Cout)


def _conv3x3_stats_kernel(x_ref, up_ref, dn_ref, scale_ref, shift_ref, w_ref,
                          y_ref, stats_ref):
    """bn1+relu fused into a 3x3 conv (stride 1, pad 1) as one K=9P matmul."""
    i = pl.program_id(1)
    last = pl.num_programs(1) - 1
    _, TH, W, P = x_ref.shape
    m = TH * W

    scale = scale_ref[...]                    # (1, P) f32 folded bn1
    shift = shift_ref[...]

    def bn_relu_bf16(v2d):                    # (rows, P) pre-bn -> bf16 post-bn
        v = v2d.astype(jnp.float32) * scale + shift
        return jnp.maximum(v, 0.0).astype(jnp.bfloat16)

    a = bn_relu_bf16(x_ref[...].reshape(m, P)).reshape(TH, W, P)
    # 1-row halos (clamped index maps); zero them at the image top / bottom so
    # they reproduce conv2's zero padding of the bn1+relu output.
    up = bn_relu_bf16(up_ref[...].reshape(W, P)).reshape(1, W, P)
    dn = bn_relu_bf16(dn_ref[...].reshape(W, P)).reshape(1, W, P)
    up = up * (i > 0).astype(jnp.bfloat16)
    dn = dn * (i < last).astype(jnp.bfloat16)

    # im2col built in bf16 (dominant temporary: (m, 9P) bf16).
    if TH > 1:
        a_up = jnp.concatenate([up, a[:TH - 1]], axis=0)   # row j sees row j-1
        a_dn = jnp.concatenate([a[1:], dn], axis=0)        # row j sees row j+1
    else:
        a_up, a_dn = up, dn
    zcol = jnp.zeros((TH, 1, P), jnp.bfloat16)
    taps = []
    # TODO(synk): on v5e, build the W-axis shifts with pltpu.roll + mask (XLU)
    # and/or use 3 accumulating K=3P matmuls to cut store traffic further.
    for r in (a_up, a, a_dn):                              # ky = 0, 1, 2
        left = jnp.concatenate([zcol, r[:, :W - 1]], axis=1)   # kx = 0
        right = jnp.concatenate([r[:, 1:], zcol], axis=1)      # kx = 2
        taps.extend([left, r, right])
    col = jnp.concatenate(taps, axis=-1).reshape(m, 9 * P)     # (m, 9P) bf16

    y = jnp.dot(col, w_ref[...], preferred_element_type=jnp.float32)  # (m, P)

    @pl.when(i == 0)
    def _init():
        stats_ref[...] = jnp.zeros_like(stats_ref)

    stats_ref[...] += jnp.concatenate(
        [jnp.sum(y, axis=0, keepdims=True),
         jnp.sum(y * y, axis=0, keepdims=True)], axis=0).reshape(1, 2, P)

    y_ref[...] = y.astype(y_ref.dtype).reshape(1, TH, W, P)


def _bn_residual_kernel(y_ref, scale_ref, shift_ref, res_ref, o_ref):
    """bn3 apply + residual add + final relu."""
    _, TH, W, C = y_ref.shape
    m = TH * W
    y = y_ref[...].reshape(m, C).astype(jnp.float32)
    out = y * scale_ref[...] + shift_ref[...] + res_ref[...].reshape(m, C)
    o_ref[...] = jnp.maximum(out, 0.0).reshape(1, TH, W, C)


# ----------------------------------------------------------------------------
# Wrappers (tiling, specs, BN stat folding)
# ----------------------------------------------------------------------------
def _vmem_limit(per_step_bytes):
    # Double-buffered pipeline blocks + in-kernel temporaries + headroom,
    # clamped to stay comfortably inside v7x's 64 MiB physical VMEM.
    return int(min(48 * 1024 * 1024, max(16 * 1024 * 1024, 4 * per_step_bytes)))


def _pick_tile_rows(H, W, P, C4, budget_bytes=12 * 1024 * 1024):
    # Size row tiles against the dominant per-tile buffers (bf16 im2col plus
    # double-buffered in/out blocks), budgeted for v7x's 64 MiB VMEM.
    per_row = W * (9 * P * 2 + 4 * P * 2 + 2 * max(P, C4) * 4 + C4 * 4)
    th = max(1, min(H, budget_bytes // max(per_row, 1)))
    while H % th != 0:
        th -= 1
    return th


def _fold_bn(stats, count, gamma, beta):
    # stats: (N, 2, C) per-batch partial [sum, sumsq]; reduce over batch.
    s = jnp.sum(stats[:, 0, :], axis=0)
    ss = jnp.sum(stats[:, 1, :], axis=0)
    mean = s / count
    var = jnp.maximum(ss / count - mean * mean, 0.0)          # biased variance
    scale = gamma.reshape(-1) * jax.lax.rsqrt(var + EPS)
    shift = beta.reshape(-1) - mean * scale
    return (scale.reshape(1, -1).astype(jnp.float32),
            shift.reshape(1, -1).astype(jnp.float32))


def _conv1x1_pass(x, w, *, scale, shift, TH):
    N, H, W, Cin = x.shape
    Cout = w.shape[1]
    grid = (N, H // TH)
    apply_pre_bn = scale is not None
    kernel = functools.partial(_conv1x1_stats_kernel, apply_pre_bn=apply_pre_bn)

    in_specs = [pl.BlockSpec((1, TH, W, Cin), lambda n, i: (n, i, 0, 0))]
    args = [x]
    if apply_pre_bn:
        in_specs += [pl.BlockSpec((1, Cin), lambda n, i: (0, 0)),
                     pl.BlockSpec((1, Cin), lambda n, i: (0, 0))]
        args += [scale, shift]
    in_specs += [pl.BlockSpec((Cin, Cout), lambda n, i: (0, 0))]
    args += [w]

    out_specs = [pl.BlockSpec((1, TH, W, Cout), lambda n, i: (n, i, 0, 0)),
                 pl.BlockSpec((1, 2, Cout), lambda n, i: (n, 0, 0))]
    out_shape = [jax.ShapeDtypeStruct((N, H, W, Cout), jnp.bfloat16),
                 jax.ShapeDtypeStruct((N, 2, Cout), jnp.float32)]

    per_step = (TH * W * Cin * x.dtype.itemsize + TH * W * Cout * (2 + 4)
                + Cin * Cout * 2 + 2 * Cout * 4)
    out1, stats = pl.pallas_call(
        kernel, grid=grid, in_specs=in_specs, out_specs=out_specs,
        out_shape=out_shape,
        compiler_params=pltpu.CompilerParams(
            dimension_semantics=("parallel", "arbitrary"),
            vmem_limit_bytes=_vmem_limit(per_step)),
    )(*args)
    return out1, stats


def _conv3x3_pass(x, scale, shift, w2b, *, TH):
    N, H, W, P = x.shape
    grid = (N, H // TH)

    def main_map(n, i):
        return (n, i, 0, 0)

    def up_map(n, i):                       # row above the tile (clamped)
        return (n, jnp.maximum(i * TH - 1, 0), 0, 0)

    def dn_map(n, i):                       # row below the tile (clamped)
        return (n, jnp.minimum(i * TH + TH, H - 1), 0, 0)

    in_specs = [
        pl.BlockSpec((1, TH, W, P), main_map),
        pl.BlockSpec((1, 1, W, P), up_map),
        pl.BlockSpec((1, 1, W, P), dn_map),
        pl.BlockSpec((1, P), lambda n, i: (0, 0)),
        pl.BlockSpec((1, P), lambda n, i: (0, 0)),
        pl.BlockSpec((9 * P, P), lambda n, i: (0, 0)),
    ]
    out_specs = [pl.BlockSpec((1, TH, W, P), main_map),
                 pl.BlockSpec((1, 2, P), lambda n, i: (n, 0, 0))]
    out_shape = [jax.ShapeDtypeStruct((N, H, W, P), jnp.bfloat16),
                 jax.ShapeDtypeStruct((N, 2, P), jnp.float32)]

    per_step = TH * W * P * (2 + 2 + 4) + TH * W * 9 * P * 2 + 9 * P * P * 2
    out2, stats = pl.pallas_call(
        _conv3x3_stats_kernel, grid=grid, in_specs=in_specs,
        out_specs=out_specs, out_shape=out_shape,
        compiler_params=pltpu.CompilerParams(
            dimension_semantics=("parallel", "arbitrary"),
            vmem_limit_bytes=_vmem_limit(per_step)),
    )(x, x, x, scale, shift, w2b)
    return out2, stats


def _bn_residual_pass(y, scale, shift, res, *, TH):
    N, H, W, C = y.shape
    grid = (N, H // TH)
    in_specs = [
        pl.BlockSpec((1, TH, W, C), lambda n, i: (n, i, 0, 0)),
        pl.BlockSpec((1, C), lambda n, i: (0, 0)),
        pl.BlockSpec((1, C), lambda n, i: (0, 0)),
        pl.BlockSpec((1, TH, W, C), lambda n, i: (n, i, 0, 0)),
    ]
    out_specs = pl.BlockSpec((1, TH, W, C), lambda n, i: (n, i, 0, 0))
    out_shape = jax.ShapeDtypeStruct((N, H, W, C), jnp.float32)
    per_step = TH * W * C * (2 + 4 + 4)
    return pl.pallas_call(
        _bn_residual_kernel, grid=grid, in_specs=in_specs,
        out_specs=out_specs, out_shape=out_shape,
        compiler_params=pltpu.CompilerParams(
            # no reduction here -> both axes parallel (uses both TCs on v7x)
            dimension_semantics=("parallel", "parallel"),
            vmem_limit_bytes=_vmem_limit(per_step)),
    )(y, scale, shift, res)


@functools.partial(jax.jit, static_argnames=("tile_rows",))
def bottleneck_forward_nhwc(x, params, *, tile_rows=None):
    """Bottleneck forward, NHWC activations end-to-end (no layout transposes)."""
    w1, g1, b1, w2, g2, b2, w3, g3, b3 = params
    N, H, W, C4 = x.shape
    P = w1.shape[1]
    assert w3.shape == (P, C4) and C4 == 4 * P, \
        "stride=1 / downsample=None requires inplanes == 4 * planes"

    TH = _pick_tile_rows(H, W, P, C4) if tile_rows is None else int(tile_rows)
    assert 1 <= TH <= H and H % TH == 0, (TH, H)

    # bf16 weights for the MXU; w2 pre-reshaped to the im2col layout (9P, P).
    w1b = w1.astype(jnp.bfloat16)                      # (C4, P)
    w2b = w2.reshape(9 * P, P).astype(jnp.bfloat16)    # (kH,kW,Cin,Cout)->(9P,P)
    w3b = w3.astype(jnp.bfloat16)                      # (P, C4)

    x = x.astype(jnp.float32)
    count = float(N * H * W)

    # pass 1: conv1 + stats
    out1_pre, stats1 = _conv1x1_pass(x, w1b, scale=None, shift=None, TH=TH)
    s1, sh1 = _fold_bn(stats1, count, g1, b1)
    # pass 2: bn1+relu -> conv2 (3x3, halo) + stats
    out2_pre, stats2 = _conv3x3_pass(out1_pre, s1, sh1, w2b, TH=TH)
    s2, sh2 = _fold_bn(stats2, count, g2, b2)
    # pass 3: bn2+relu -> conv3 + stats
    out3_pre, stats3 = _conv1x1_pass(out2_pre, w3b, scale=s2, shift=sh2, TH=TH)
    s3, sh3 = _fold_bn(stats3, count, g3, b3)
    # pass 4: bn3 + residual + relu
    return _bn_residual_pass(out3_pre, s3, sh3, x, TH=TH)


def bottleneck_forward(x_nchw, params, *, tile_rows=None):
    # NCHW drop-in wrapper for parity with the PyTorch module.  In an NHWC
    # end-to-end model call bottleneck_forward_nhwc directly: each of these
    # transposes is a full extra HBM round trip executed by XLA.
    x = jnp.transpose(x_nchw, (0, 2, 3, 1))
    out = bottleneck_forward_nhwc(x, params, tile_rows=tile_rows)
    return jnp.transpose(out, (0, 3, 1, 2))


# ----------------------------------------------------------------------------
# Params & pure-JAX reference
# ----------------------------------------------------------------------------
def init_params(key, inplanes, planes):
    # PyTorch conv weight layout is (Cout, Cin, kH, kW); rearrange to the
    # layouts the kernels expect.
    k1, k2, k3 = jax.random.split(key, 3)
    w1_t = jax.random.normal(k1, (planes, inplanes, 1, 1), jnp.float32) * 0.1
    w2_t = jax.random.normal(k2, (planes, planes, 3, 3), jnp.float32) * 0.1
    w3_t = jax.random.normal(k3, (planes * 4, planes, 1, 1), jnp.float32) * 0.1
    w1 = jnp.transpose(w1_t[:, :, 0, 0], (1, 0))     # (Cin, P)
    w2 = jnp.transpose(w2_t, (2, 3, 1, 0))           # (kH, kW, Cin, Cout)
    w3 = jnp.transpose(w3_t[:, :, 0, 0], (1, 0))     # (P, 4P)
    g1, b1 = jnp.ones((1, planes)), jnp.zeros((1, planes))
    g2, b2 = jnp.ones((1, planes)), jnp.zeros((1, planes))
    g3, b3 = jnp.ones((1, planes * 4)), jnp.zeros((1, planes * 4))
    return (w1, g1, b1, w2, g2, b2, w3, g3, b3)


def reference_forward(x_nchw, params):
    # f32, HIGHEST-precision reference of the same math, for validation.
    w1, g1, b1, w2, g2, b2, w3, g3, b3 = params
    x = jnp.transpose(x_nchw, (0, 2, 3, 1))

    def conv(x, w, pad):
        return jax.lax.conv_general_dilated(
            x, w, window_strides=(1, 1), padding=pad,
            dimension_numbers=('NHWC', 'HWIO', 'NHWC'),
            precision=jax.lax.Precision.HIGHEST)

    def bn(x, g, b):
        mean = jnp.mean(x, axis=(0, 1, 2), keepdims=True)
        var = jnp.mean((x - mean) ** 2, axis=(0, 1, 2), keepdims=True)
        return ((x - mean) * jax.lax.rsqrt(var + EPS) * g.reshape(1, 1, 1, -1)
                + b.reshape(1, 1, 1, -1))

    out = jax.nn.relu(bn(conv(x, w1.reshape(1, 1, *w1.shape), 'VALID'), g1, b1))
    out = jax.nn.relu(bn(conv(out, w2, 'SAME'), g2, b2))
    out = bn(conv(out, w3.reshape(1, 1, *w3.shape), 'VALID'), g3, b3)
    out = jax.nn.relu(out + x)
    return jnp.transpose(out, (0, 3, 1, 2))


if __name__ == "__main__":
    key = jax.random.PRNGKey(0)
    kx, kp = jax.random.split(key)

    # Small shapes consistent with the module: inplanes == planes * 4.
    N, inplanes, H, W = 2, 32, 8, 8
    planes = inplanes // 4

    x = jax.random.normal(kx, (N, inplanes, H, W), jnp.float32)
    params = init_params(kp, inplanes, planes)

    # tile_rows=4 forces a 2-tile H grid so the cross-tile BN-stat
    # accumulation / halo logic is actually exercised.
    out = bottleneck_forward(x, params, tile_rows=4)
    out = jax.block_until_ready(out)
    assert out.shape == (N, inplanes, H, W)

    ref = reference_forward(x, params)
    err = float(jnp.max(jnp.abs(out - ref)))
    # Tolerance covers the intentional bf16 MXU operands + bf16 HBM
    # intermediates vs. the f32 HIGHEST reference.
    assert jnp.allclose(out, ref, atol=3e-2, rtol=3e-2), err

    print("KERNEL_OK")
</pallas_src>

<mosaic_0001>
module attributes {stable_mosaic.version = 11 : i64} {
  func.func @_conv1x1_stats_kernel(%arg0: i32, %arg1: i32, %arg2: memref<1x4x8x8xbf16, #tpu.memory_space<vmem>>, %arg3: memref<1x8xf32, #tpu.memory_space<vmem>>, %arg4: memref<1x8xf32, #tpu.memory_space<vmem>>, %arg5: memref<8x32xbf16, #tpu.memory_space<vmem>>, %arg6: memref<1x4x8x32xbf16, #tpu.memory_space<vmem>>, %arg7: memref<1x2x32xf32, #tpu.memory_space<vmem>>) attributes {dimension_semantics = [#tpu.dimension_semantics<parallel>, #tpu.dimension_semantics<arbitrary>], iteration_bounds = array<i64: 2, 2>, scalar_prefetch = 0 : i64, scratch_operands = 0 : i64, tpu.core_type = #tpu.core_type<tc>, window_params = [{transform_indices = @transform_0, window_bounds = array<i64: 1, 4, 8, 8>}, {pipeline_mode = #tpu.pipeline_mode<synchronous>, transform_indices = @transform_1, window_bounds = array<i64: 1, 8>}, {pipeline_mode = #tpu.pipeline_mode<synchronous>, transform_indices = @transform_2, window_bounds = array<i64: 1, 8>}, {pipeline_mode = #tpu.pipeline_mode<synchronous>, transform_indices = @transform_3, window_bounds = array<i64: 8, 32>}, {transform_indices = @transform_4, window_bounds = array<i64: 1, 4, 8, 32>}, {transform_indices = @transform_5, window_bounds = array<i64: 1, 2, 32>}]} {
    %c0 = arith.constant 0 : index
    %c0_0 = arith.constant 0 : index
    %c0_1 = arith.constant 0 : index
    %c0_2 = arith.constant 0 : index
    %0 = vector.load %arg2[%c0, %c0_0, %c0_1, %c0_2] : memref<1x4x8x8xbf16, #tpu.memory_space<vmem>>, vector<1x4x8x8xbf16>
    %1 = vector.shape_cast %0 : vector<1x4x8x8xbf16> to vector<32x8xbf16>
    %2 = arith.extf %1 : vector<32x8xbf16> to vector<32x8xf32>
    %c0_3 = arith.constant 0 : index
    %c0_4 = arith.constant 0 : index
    %3 = vector.load %arg3[%c0_3, %c0_4] : memref<1x8xf32, #tpu.memory_space<vmem>>, vector<1x8xf32>
    %4 = vector.broadcast %3 : vector<1x8xf32> to vector<32x8xf32>
    %5 = arith.mulf %2, %4 : vector<32x8xf32>
    %c0_5 = arith.constant 0 : index
    %c0_6 = arith.constant 0 : index
    %6 = vector.load %arg4[%c0_5, %c0_6] : memref<1x8xf32, #tpu.memory_space<vmem>>, vector<1x8xf32>
    %7 = vector.broadcast %6 : vector<1x8xf32> to vector<32x8xf32>
    %8 = arith.addf %5, %7 : vector<32x8xf32>
    %cst = arith.constant 0.000000e+00 : f32
    %9 = vector.broadcast %cst : f32 to vector<32x8xf32>
    %10 = arith.maximumf %8, %9 : vector<32x8xf32>
    %11 = arith.truncf %10 : vector<32x8xf32> to vector<32x8xbf16>
    %c0_7 = arith.constant 0 : index
    %c0_8 = arith.constant 0 : index
    %12 = vector.load %arg5[%c0_7, %c0_8] : memref<8x32xbf16, #tpu.memory_space<vmem>>, vector<8x32xbf16>
    %cst_9 = arith.constant dense<0.000000e+00> : vector<32x32xf32>
    %13 = tpu.matmul %11, %12, %cst_9 {dimension_numbers = #tpu.dot_dimension_numbers<[1], [0], [0], [1], [0, 0, 1, 1], [], []>} : vector<32x8xbf16>, vector<8x32xbf16>, vector<32x32xf32> -> vector<32x32xf32>
    %c0_i32 = arith.constant 0 : i32
    %14 = arith.cmpi eq, %arg1, %c0_i32 : i32
    %15 = arith.extui %14 : i1 to i32
    %c0_i32_10 = arith.constant 0 : i32
    %16 = arith.cmpi ne, %15, %c0_i32_10 : i32
    scf.if %16 {
      %cst_23 = arith.constant 0.000000e+00 : f32
      %30 = vector.broadcast %cst_23 : f32 to vector<1x2x32xf32>
      %c0_24 = arith.constant 0 : index
      %c0_25 = arith.constant 0 : index
      %c0_26 = arith.constant 0 : index
      %31 = vector.load %arg7[%c0_24, %c0_25, %c0_26] : memref<1x2x32xf32, #tpu.memory_space<vmem>>, vector<1x2x32xf32>
      tpu.vector_store %arg7[%c0_24, %c0_25, %c0_26], %30 {strides = array<i32>} : memref<1x2x32xf32, #tpu.memory_space<vmem>>, vector<1x2x32xf32>,
    } else {
    }
    %c0_11 = arith.constant 0 : index
    %c0_12 = arith.constant 0 : index
    %c0_13 = arith.constant 0 : index
    %17 = vector.load %arg7[%c0_11, %c0_12, %c0_13] : memref<1x2x32xf32, #tpu.memory_space<vmem>>, vector<1x2x32xf32>
    %cst_14 = arith.constant dense<0.000000e+00> : vector<32xf32>
    %18 = vector.multi_reduction <add>, %13, %cst_14 [0] : vector<32x32xf32> to vector<32xf32>
    %19 = vector.shape_cast %18 : vector<32xf32> to vector<1x32xf32>
    %20 = arith.mulf %13, %13 : vector<32x32xf32>
    %cst_15 = arith.constant dense<0.000000e+00> : vector<32xf32>
    %21 = vector.multi_reduction <add>, %20, %cst_15 [0] : vector<32x32xf32> to vector<32xf32>
    %22 = vector.shape_cast %21 : vector<32xf32> to vector<1x32xf32>
    %23 = tpu.concatenate %19, %22 in 0 : vector<1x32xf32>, vector<1x32xf32> -> vector<2x32xf32>
    %24 = vector.shape_cast %23 : vector<2x32xf32> to vector<1x2x32xf32>
    %25 = arith.addf %17, %24 : vector<1x2x32xf32>
    %c0_16 = arith.constant 0 : index
    %c0_17 = arith.constant 0 : index
    %c0_18 = arith.constant 0 : index
    %26 = vector.load %arg7[%c0_16, %c0_17, %c0_18] : memref<1x2x32xf32, #tpu.memory_space<vmem>>, vector<1x2x32xf32>
    tpu.vector_store %arg7[%c0_16, %c0_17, %c0_18], %25 {strides = array<i32>} : memref<1x2x32xf32, #tpu.memory_space<vmem>>, vector<1x2x32xf32>,
    %27 = arith.truncf %13 : vector<32x32xf32> to vector<32x32xbf16>
    %28 = vector.shape_cast %27 : vector<32x32xbf16> to vector<1x4x8x32xbf16>
    %c0_19 = arith.constant 0 : index
    %c0_20 = arith.constant 0 : index
    %c0_21 = arith.constant 0 : index
    %c0_22 = arith.constant 0 : index
    %29 = vector.load %arg6[%c0_19, %c0_20, %c0_21, %c0_22] : memref<1x4x8x32xbf16, #tpu.memory_space<vmem>>, vector<1x4x8x32xbf16>
    tpu.vector_store %arg6[%c0_19, %c0_20, %c0_21, %c0_22], %28 {strides = array<i32>} : memref<1x4x8x32xbf16, #tpu.memory_space<vmem>>, vector<1x4x8x32xbf16>,
    return
  }
  func.func @transform_0(%arg0: i32, %arg1: i32) -> (i32, i32, i32, i32) {
    %c0_i32 = arith.constant 0 : i32
    %c0_i32_0 = arith.constant 0 : i32
    %c0_i32_1 = arith.constant 0 : i32
    return %arg0, %arg1, %c0_i32, %c0_i32_0 : i32, i32, i32, i32
  }
  func.func @transform_1(%arg0: i32, %arg1: i32) -> (i32, i32) {
    %c0_i32 = arith.constant 0 : i32
    %c0_i32_0 = arith.constant 0 : i32
    %c0_i32_1 = arith.constant 0 : i32
    return %c0_i32, %c0_i32_0 : i32, i32
  }
  func.func @transform_2(%arg0: i32, %arg1: i32) -> (i32, i32) {
    %c0_i32 = arith.constant 0 : i32
    %c0_i32_0 = arith.constant 0 : i32
    %c0_i32_1 = arith.constant 0 : i32
    return %c0_i32, %c0_i32_0 : i32, i32
  }
  func.func @transform_3(%arg0: i32, %arg1: i32) -> (i32, i32) {
    %c0_i32 = arith.constant 0 : i32
    %c0_i32_0 = arith.constant 0 : i32
    %c0_i32_1 = arith.constant 0 : i32
    return %c0_i32, %c0_i32_0 : i32, i32
  }
  func.func @transform_4(%arg0: i32, %arg1: i32) -> (i32, i32, i32, i32) {
    %c0_i32 = arith.constant 0 : i32
    %c0_i32_0 = arith.constant 0 : i32
    %c0_i32_1 = arith.constant 0 : i32
    return %arg0, %arg1, %c0_i32, %c0_i32_0 : i32, i32, i32, i32
  }
  func.func @transform_5(%arg0: i32, %arg1: i32) -> (i32, i32, i32) {
    %c0_i32 = arith.constant 0 : i32
    %c0_i32_0 = arith.constant 0 : i32
    %c0_i32_1 = arith.constant 0 : i32
    return %arg0, %c0_i32, %c0_i32_0 : i32, i32, i32
  }
}

module attributes {stable_mosaic.version = 11 : i64} {
  func.func @_conv3x3_stats_kernel(%arg0: i32, %arg1: i32, %arg2: memref<1x4x8x8xbf16, #tpu.memory_space<vmem>>, %arg3: memref<1x1x8x8xbf16, #tpu.memory_space<vmem>>, %arg4: memref<1x1x8x8xbf16, #tpu.memory_space<vmem>>, %arg5: memref<1x8xf32, #tpu.memory_space<vmem>>, %arg6: memref<1x8xf32, #tpu.memory_space<vmem>>, %arg7: memref<72x8xbf16, #tpu.memory_space<vmem>>, %arg8: memref<1x4x8x8xbf16, #tpu.memory_space<vmem>>, %arg9: memref<1x2x8xf32, #tpu.memory_space<vmem>>) attributes {dimension_semantics = [#tpu.dimension_semantics<parallel>, #tpu.dimension_semantics<arbitrary>], iteration_bounds = array<i64: 2, 2>, scalar_prefetch = 0 : i64, scratch_operands = 0 : i64, tpu.core_type = #tpu.core_type<tc>, window_params = [{transform_indices = @transform_0, window_bounds = array<i64: 1, 4, 8, 8>}, {transform_indices = @transform_1, window_bounds = array<i64: 1, 1, 8, 8>}, {transform_indices = @transform_2, window_bounds = array<i64: 1, 1, 8, 8>}, {pipeline_mode = #tpu.pipeline_mode<synchronous>, transform_indices = @transform_3, window_bounds = array<i64: 1, 8>}, {pipeline_mode = #tpu.pipeline_mode<synchronous>, transform_indices = @transform_4, window_bounds = array<i64: 1, 8>}, {pipeline_mode = #tpu.pipeline_mode<synchronous>, transform_indices = @transform_5, window_bounds = array<i64: 72, 8>}, {transform_indices = @transform_6, window_bounds = array<i64: 1, 4, 8, 8>}, {transform_indices = @transform_7, window_bounds = array<i64: 1, 2, 8>}]} {
    %c0 = arith.constant 0 : index
    %c0_0 = arith.constant 0 : index
    %0 = vector.load %arg5[%c0, %c0_0] : memref<1x8xf32, #tpu.memory_space<vmem>>, vector<1x8xf32>
    %c0_1 = arith.constant 0 : index
    %c0_2 = arith.constant 0 : index
    %1 = vector.load %arg6[%c0_1, %c0_2] : memref<1x8xf32, #tpu.memory_space<vmem>>, vector<1x8xf32>
    %c0_3 = arith.constant 0 : index
    %c0_4 = arith.constant 0 : index
    %c0_5 = arith.constant 0 : index
    %c0_6 = arith.constant 0 : index
    %2 = vector.load %arg2[%c0_3, %c0_4, %c0_5, %c0_6] : memref<1x4x8x8xbf16, #tpu.memory_space<vmem>>, vector<1x4x8x8xbf16>
    %3 = vector.shape_cast %2 : vector<1x4x8x8xbf16> to vector<32x8xbf16>
    %4 = arith.extf %3 : vector<32x8xbf16> to vector<32x8xf32>
    %5 = vector.broadcast %0 : vector<1x8xf32> to vector<32x8xf32>
    %6 = arith.mulf %4, %5 : vector<32x8xf32>
    %7 = vector.broadcast %1 : vector<1x8xf32> to vector<32x8xf32>
    %8 = arith.addf %6, %7 : vector<32x8xf32>
    %cst = arith.constant 0.000000e+00 : f32
    %9 = vector.broadcast %cst : f32 to vector<32x8xf32>
    %10 = arith.maximumf %8, %9 : vector<32x8xf32>
    %11 = arith.truncf %10 : vector<32x8xf32> to vector<32x8xbf16>
    %12 = vector.shape_cast %11 : vector<32x8xbf16> to vector<4x8x8xbf16>
    %c0_7 = arith.constant 0 : index
    %c0_8 = arith.constant 0 : index
    %c0_9 = arith.constant 0 : index
    %c0_10 = arith.constant 0 : index
    %13 = vector.load %arg3[%c0_7, %c0_8, %c0_9, %c0_10] : memref<1x1x8x8xbf16, #tpu.memory_space<vmem>>, vector<1x1x8x8xbf16>
    %14 = vector.shape_cast %13 : vector<1x1x8x8xbf16> to vector<8x8xbf16>
    %15 = arith.extf %14 : vector<8x8xbf16> to vector<8x8xf32>
    %16 = vector.broadcast %0 : vector<1x8xf32> to vector<8x8xf32>
    %17 = arith.mulf %15, %16 : vector<8x8xf32>
    %18 = vector.broadcast %1 : vector<1x8xf32> to vector<8x8xf32>
    %19 = arith.addf %17, %18 : vector<8x8xf32>
    %cst_11 = arith.constant 0.000000e+00 : f32
    %20 = vector.broadcast %cst_11 : f32 to vector<8x8xf32>
    %21 = arith.maximumf %19, %20 : vector<8x8xf32>
    %22 = arith.truncf %21 : vector<8x8xf32> to vector<8x8xbf16>
    %23 = vector.shape_cast %22 : vector<8x8xbf16> to vector<1x8x8xbf16>
    %c0_12 = arith.constant 0 : index
    %c0_13 = arith.constant 0 : index
    %c0_14 = arith.constant 0 : index
    %c0_15 = arith.constant 0 : index
    %24 = vector.load %arg4[%c0_12, %c0_13, %c0_14, %c0_15] : memref<1x1x8x8xbf16, #tpu.memory_space<vmem>>, vector<1x1x8x8xbf16>
    %25 = vector.shape_cast %24 : vector<1x1x8x8xbf16> to vector<8x8xbf16>
    %26 = arith.extf %25 : vector<8x8xbf16> to vector<8x8xf32>
    %27 = vector.broadcast %0 : vector<1x8xf32> to vector<8x8xf32>
    %28 = arith.mulf %26, %27 : vector<8x8xf32>
    %29 = vector.broadcast %1 : vector<1x8xf32> to vector<8x8xf32>
    %30 = arith.addf %28, %29 : vector<8x8xf32>
    %cst_16 = arith.constant 0.000000e+00 : f32
    %31 = vector.broadcast %cst_16 : f32 to vector<8x8xf32>
    %32 = arith.maximumf %30, %31 : vector<8x8xf32>
    %33 = arith.truncf %32 : vector<8x8xf32> to vector<8x8xbf16>
    %34 = vector.shape_cast %33 : vector<8x8xbf16> to vector<1x8x8xbf16>
    %c0_i32 = arith.constant 0 : i32
    %35 = arith.cmpi sgt, %arg1, %c0_i32 : i32
    %36 = arith.extui %35 : i1 to i32
    %37 = arith.sitofp %36 : i32 to f32
    %38 = arith.truncf %37 : f32 to bf16
    %39 = vector.broadcast %38 : bf16 to vector<1x8x8xbf16>
    %40 = arith.mulf %23, %39 : vector<1x8x8xbf16>
    %c1_i32 = arith.constant 1 : i32
    %41 = arith.cmpi slt, %arg1, %c1_i32 : i32
    %42 = arith.extui %41 : i1 to i32
    %43 = arith.sitofp %42 : i32 to f32
    %44 = arith.truncf %43 : f32 to bf16
    %45 = vector.broadcast %44 : bf16 to vector<1x8x8xbf16>
    %46 = arith.mulf %34, %45 : vector<1x8x8xbf16>
    %47 = vector.extract_strided_slice %12 {offsets = [0, 0, 0], sizes = [3, 8, 8], strides = [1, 1, 1]} : vector<4x8x8xbf16> to vector<3x8x8xbf16>
    %48 = tpu.concatenate %40, %47 in 0 : vector<1x8x8xbf16>, vector<3x8x8xbf16> -> vector<4x8x8xbf16>
    %49 = vector.extract_strided_slice %12 {offsets = [1, 0, 0], sizes = [3, 8, 8], strides = [1, 1, 1]} : vector<4x8x8xbf16> to vector<3x8x8xbf16>
    %50 = tpu.concatenate %49, %46 in 0 : vector<3x8x8xbf16>, vector<1x8x8xbf16> -> vector<4x8x8xbf16>
    %cst_17 = arith.constant 0.000000e+00 : bf16
    %51 = vector.broadcast %cst_17 : bf16 to vector<4x1x8xbf16>
    %52 = vector.extract_strided_slice %48 {offsets = [0, 0, 0], sizes = [4, 7, 8], strides = [1, 1, 1]} : vector<4x8x8xbf16> to vector<4x7x8xbf16>
    %53 = tpu.concatenate %51, %52 in 1 : vector<4x1x8xbf16>, vector<4x7x8xbf16> -> vector<4x8x8xbf16>
    %54 = vector.extract_strided_slice %48 {offsets = [0, 1, 0], sizes = [4, 7, 8], strides = [1, 1, 1]} : vector<4x8x8xbf16> to vector<4x7x8xbf16>
    %55 = tpu.concatenate %54, %51 in 1 : vector<4x7x8xbf16>, vector<4x1x8xbf16> -> vector<4x8x8xbf16>
    %56 = vector.extract_strided_slice %12 {offsets = [0, 0, 0], sizes = [4, 7, 8], strides = [1, 1, 1]} : vector<4x8x8xbf16> to vector<4x7x8xbf16>
    %57 = tpu.concatenate %51, %56 in 1 : vector<4x1x8xbf16>, vector<4x7x8xbf16> -> vector<4x8x8xbf16>
    %58 = vector.extract_strided_slice %12 {offsets = [0, 1, 0], sizes = [4, 7, 8], strides = [1, 1, 1]} : vector<4x8x8xbf16> to vector<4x7x8xbf16>
    %59 = tpu.concatenate %58, %51 in 1 : vector<4x7x8xbf16>, vector<4x1x8xbf16> -> vector<4x8x8xbf16>
    %60 = vector.extract_strided_slice %50 {offsets = [0, 0, 0], sizes = [4, 7, 8], strides = [1, 1, 1]} : vector<4x8x8xbf16> to vector<4x7x8xbf16>
    %61 = tpu.concatenate %51, %60 in 1 : vector<4x1x8xbf16>, vector<4x7x8xbf16> -> vector<4x8x8xbf16>
    %62 = vector.extract_strided_slice %50 {offsets = [0, 1, 0], sizes = [4, 7, 8], strides = [1, 1, 1]} : vector<4x8x8xbf16> to vector<4x7x8xbf16>
    %63 = tpu.concatenate %62, %51 in 1 : vector<4x7x8xbf16>, vector<4x1x8xbf16> -> vector<4x8x8xbf16>
    %64 = tpu.concatenate %53, %48, %55, %57, %12, %59, %61, %50, %63 in 2 : vector<4x8x8xbf16>, vector<4x8x8xbf16>, vector<4x8x8xbf16>, vector<4x8x8xbf16>, vector<4x8x8xbf16>, vector<4x8x8xbf16>, vector<4x8x8xbf16>, vector<4x8x8xbf16>, vector<4x8x8xbf16> -> vector<4x8x72xbf16>
    %65 = vector.shape_cast %64 : vector<4x8x72xbf16> to vector<32x72xbf16>
    %c0_18 = arith.constant 0 : index
    %c0_19 = arith.constant 0 : index
    %66 = vector.load %arg7[%c0_18, %c0_19] : memref<72x8xbf16, #tpu.memory_space<vmem>>, vector<72x8xbf16>
    %cst_20 = arith.constant dense<0.000000e+00> : vector<32x8xf32>
    %67 = tpu.matmul %65, %66, %cst_20 {dimension_numbers = #tpu.dot_dimension_numbers<[1], [0], [0], [1], [0, 0, 1, 1], [], []>} : vector<32x72xbf16>, vector<72x8xbf16>, vector<32x8xf32> -> vector<32x8xf32>
    %c0_i32_21 = arith.constant 0 : i32
    %68 = arith.cmpi eq, %arg1, %c0_i32_21 : i32
    %69 = arith.extui %68 : i1 to i32
    %c0_i32_22 = arith.constant 0 : i32
    %70 = arith.cmpi ne, %69, %c0_i32_22 : i32
    scf.if %70 {
      %cst_35 = arith.constant 0.000000e+00 : f32
      %84 = vector.broadcast %cst_35 : f32 to vector<1x2x8xf32>
      %c0_36 = arith.constant 0 : index
      %c0_37 = arith.constant 0 : index
      %c0_38 = arith.constant 0 : index
      %85 = vector.load %arg9[%c0_36, %c0_37, %c0_38] : memref<1x2x8xf32, #tpu.memory_space<vmem>>, vector<1x2x8xf32>
      tpu.vector_store %arg9[%c0_36, %c0_37, %c0_38], %84 {strides = array<i32>} : memref<1x2x8xf32, #tpu.memory_space<vmem>>, vector<1x2x8xf32>,
    } else {
    }
    %c0_23 = arith.constant 0 : index
    %c0_24 = arith.constant 0 : index
    %c0_25 = arith.constant 0 : index
    %71 = vector.load %arg9[%c0_23, %c0_24, %c0_25] : memref<1x2x8xf32, #tpu.memory_space<vmem>>, vector<1x2x8xf32>
    %cst_26 = arith.constant dense<0.000000e+00> : vector<8xf32>
    %72 = vector.multi_reduction <add>, %67, %cst_26 [0] : vector<32x8xf32> to vector<8xf32>
    %73 = vector.shape_cast %72 : vector<8xf32> to vector<1x8xf32>
    %74 = arith.mulf %67, %67 : vector<32x8xf32>
    %cst_27 = arith.constant dense<0.000000e+00> : vector<8xf32>
    %75 = vector.multi_reduction <add>, %74, %cst_27 [0] : vector<32x8xf32> to vector<8xf32>
    %76 = vector.shape_cast %75 : vector<8xf32> to vector<1x8xf32>
    %77 = tpu.concatenate %73, %76 in 0 : vector<1x8xf32>, vector<1x8xf32> -> vector<2x8xf32>
    %78 = vector.shape_cast %77 : vector<2x8xf32> to vector<1x2x8xf32>
    %79 = arith.addf %71, %78 : vector<1x2x8xf32>
    %c0_28 = arith.constant 0 : index
    %c0_29 = arith.constant 0 : index
    %c0_30 = arith.constant 0 : index
    %80 = vector.load %arg9[%c0_28, %c0_29, %c0_30] : memref<1x2x8xf32, #tpu.memory_space<vmem>>, vector<1x2x8xf32>
    tpu.vector_store %arg9[%c0_28, %c0_29, %c0_30], %79 {strides = array<i32>} : memref<1x2x8xf32, #tpu.memory_space<vmem>>, vector<1x2x8xf32>,
    %81 = arith.truncf %67 : vector<32x8xf32> to vector<32x8xbf16>
    %82 = vector.shape_cast %81 : vector<32x8xbf16> to vector<1x4x8x8xbf16>
    %c0_31 = arith.constant 0 : index
    %c0_32 = arith.constant 0 : index
    %c0_33 = arith.constant 0 : index
    %c0_34 = arith.constant 0 : index
    %83 = vector.load %arg8[%c0_31, %c0_32, %c0_33, %c0_34] : memref<1x4x8x8xbf16, #tpu.memory_space<vmem>>, vector<1x4x8x8xbf16>
    tpu.vector_store %arg8[%c0_31, %c0_32, %c0_33, %c0_34], %82 {strides = array<i32>} : memref<1x4x8x8xbf16, #tpu.memory_space<vmem>>, vector<1x4x8x8xbf16>,
    return
  }
  func.func @transform_0(%arg0: i32, %arg1: i32) -> (i32, i32, i32, i32) {
    %c0_i32 = arith.constant 0 : i32
    %c0_i32_0 = arith.constant 0 : i32
    %c0_i32_1 = arith.constant 0 : i32
    return %arg0, %arg1, %c0_i32, %c0_i32_0 : i32, i32, i32, i32
  }
  func.func @transform_1(%arg0: i32, %arg1: i32) -> (i32, i32, i32, i32) {
    %c4_i32 = arith.constant 4 : i32
    %0 = arith.muli %arg1, %c4_i32 : i32
    %c1_i32 = arith.constant 1 : i32
    %1 = arith.subi %0, %c1_i32 : i32
    %c0_i32 = arith.constant 0 : i32
    %2 = arith.maxsi %1, %c0_i32 : i32
    %c0_i32_0 = arith.constant 0 : i32
    %c0_i32_1 = arith.constant 0 : i32
    %c0_i32_2 = arith.constant 0 : i32
    return %arg0, %2, %c0_i32_0, %c0_i32_1 : i32, i32, i32, i32
  }
  func.func @transform_2(%arg0: i32, %arg1: i32) -> (i32, i32, i32, i32) {
    %c4_i32 = arith.constant 4 : i32
    %0 = arith.muli %arg1, %c4_i32 : i32
    %c4_i32_0 = arith.constant 4 : i32
    %1 = arith.addi %0, %c4_i32_0 : i32
    %c7_i32 = arith.constant 7 : i32
    %2 = arith.minsi %1, %c7_i32 : i32
    %c0_i32 = arith.constant 0 : i32
    %c0_i32_1 = arith.constant 0 : i32
    %c0_i32_2 = arith.constant 0 : i32
    return %arg0, %2, %c0_i32, %c0_i32_1 : i32, i32, i32, i32
  }
  func.func @transform_3(%arg0: i32, %arg1: i32) -> (i32, i32) {
    %c0_i32 = arith.constant 0 : i32
    %c0_i32_0 = arith.constant 0 : i32
    %c0_i32_1 = arith.constant 0 : i32
    return %c0_i32, %c0_i32_0 : i32, i32
  }
  func.func @transform_4(%arg0: i32, %arg1: i32) -> (i32, i32) {
    %c0_i32 = arith.constant 0 : i32
    %c0_i32_0 = arith.constant 0 : i32
    %c0_i32_1 = arith.constant 0 : i32
    return %c0_i32, %c0_i32_0 : i32, i32
  }
  func.func @transform_5(%arg0: i32, %arg1: i32) -> (i32, i32) {
    %c0_i32 = arith.constant 0 : i32
    %c0_i32_0 = arith.constant 0 : i32
    %c0_i32_1 = arith.constant 0 : i32
    return %c0_i32, %c0_i32_0 : i32, i32
  }
  func.func @transform_6(%arg0: i32, %arg1: i32) -> (i32, i32, i32, i32) {
    %c0_i32 = arith.constant 0 : i32
    %c0_i32_0 = arith.constant 0 : i32
    %c0_i32_1 = arith.constant 0 : i32
    return %arg0, %arg1, %c0_i32, %c0_i32_0 : i32, i32, i32, i32
  }
  func.func @transform_7(%arg0: i32, %arg1: i32) -> (i32, i32, i32) {
    %c0_i32 = arith.constant 0 : i32
    %c0_i32_0 = arith.constant 0 : i32
    %c0_i32_1 = arith.constant 0 : i32
    return %arg0, %c0_i32, %c0_i32_0 : i32, i32, i32
  }
}

module attributes {stable_mosaic.version = 11 : i64} {
  func.func @_conv1x1_stats_kernel(%arg0: i32, %arg1: i32, %arg2: memref<1x4x8x32xf32, #tpu.memory_space<vmem>>, %arg3: memref<32x8xbf16, #tpu.memory_space<vmem>>, %arg4: memref<1x4x8x8xbf16, #tpu.memory_space<vmem>>, %arg5: memref<1x2x8xf32, #tpu.memory_space<vmem>>) attributes {dimension_semantics = [#tpu.dimension_semantics<parallel>, #tpu.dimension_semantics<arbitrary>], iteration_bounds = array<i64: 2, 2>, scalar_prefetch = 0 : i64, scratch_operands = 0 : i64, tpu.core_type = #tpu.core_type<tc>, window_params = [{transform_indices = @transform_0, window_bounds = array<i64: 1, 4, 8, 32>}, {pipeline_mode = #tpu.pipeline_mode<synchronous>, transform_indices = @transform_1, window_bounds = array<i64: 32, 8>}, {transform_indices = @transform_2, window_bounds = array<i64: 1, 4, 8, 8>}, {transform_indices = @transform_3, window_bounds = array<i64: 1, 2, 8>}]} {
    %c0 = arith.constant 0 : index
    %c0_0 = arith.constant 0 : index
    %c0_1 = arith.constant 0 : index
    %c0_2 = arith.constant 0 : index
    %0 = vector.load %arg2[%c0, %c0_0, %c0_1, %c0_2] : memref<1x4x8x32xf32, #tpu.memory_space<vmem>>, vector<1x4x8x32xf32>
    %1 = vector.shape_cast %0 : vector<1x4x8x32xf32> to vector<32x32xf32>
    %2 = arith.truncf %1 : vector<32x32xf32> to vector<32x32xbf16>
    %c0_3 = arith.constant 0 : index
    %c0_4 = arith.constant 0 : index
    %3 = vector.load %arg3[%c0_3, %c0_4] : memref<32x8xbf16, #tpu.memory_space<vmem>>, vector<32x8xbf16>
    %cst = arith.constant dense<0.000000e+00> : vector<32x8xf32>
    %4 = tpu.matmul %2, %3, %cst {dimension_numbers = #tpu.dot_dimension_numbers<[1], [0], [0], [1], [0, 0, 1, 1], [], []>} : vector<32x32xbf16>, vector<32x8xbf16>, vector<32x8xf32> -> vector<32x8xf32>
    %c0_i32 = arith.constant 0 : i32
    %5 = arith.cmpi eq, %arg1, %c0_i32 : i32
    %6 = arith.extui %5 : i1 to i32
    %c0_i32_5 = arith.constant 0 : i32
    %7 = arith.cmpi ne, %6, %c0_i32_5 : i32
    scf.if %7 {
      %cst_18 = arith.constant 0.000000e+00 : f32
      %21 = vector.broadcast %cst_18 : f32 to vector<1x2x8xf32>
      %c0_19 = arith.constant 0 : index
      %c0_20 = arith.constant 0 : index
      %c0_21 = arith.constant 0 : index
      %22 = vector.load %arg5[%c0_19, %c0_20, %c0_21] : memref<1x2x8xf32, #tpu.memory_space<vmem>>, vector<1x2x8xf32>
      tpu.vector_store %arg5[%c0_19, %c0_20, %c0_21], %21 {strides = array<i32>} : memref<1x2x8xf32, #tpu.memory_space<vmem>>, vector<1x2x8xf32>,
    } else {
    }
    %c0_6 = arith.constant 0 : index
    %c0_7 = arith.constant 0 : index
    %c0_8 = arith.constant 0 : index
    %8 = vector.load %arg5[%c0_6, %c0_7, %c0_8] : memref<1x2x8xf32, #tpu.memory_space<vmem>>, vector<1x2x8xf32>
    %cst_9 = arith.constant dense<0.000000e+00> : vector<8xf32>
    %9 = vector.multi_reduction <add>, %4, %cst_9 [0] : vector<32x8xf32> to vector<8xf32>
    %10 = vector.shape_cast %9 : vector<8xf32> to vector<1x8xf32>
    %11 = arith.mulf %4, %4 : vector<32x8xf32>
    %cst_10 = arith.constant dense<0.000000e+00> : vector<8xf32>
    %12 = vector.multi_reduction <add>, %11, %cst_10 [0] : vector<32x8xf32> to vector<8xf32>
    %13 = vector.shape_cast %12 : vector<8xf32> to vector<1x8xf32>
    %14 = tpu.concatenate %10, %13 in 0 : vector<1x8xf32>, vector<1x8xf32> -> vector<2x8xf32>
    %15 = vector.shape_cast %14 : vector<2x8xf32> to vector<1x2x8xf32>
    %16 = arith.addf %8, %15 : vector<1x2x8xf32>
    %c0_11 = arith.constant 0 : index
    %c0_12 = arith.constant 0 : index
    %c0_13 = arith.constant 0 : index
    %17 = vector.load %arg5[%c0_11, %c0_12, %c0_13] : memref<1x2x8xf32, #tpu.memory_space<vmem>>, vector<1x2x8xf32>
    tpu.vector_store %arg5[%c0_11, %c0_12, %c0_13], %16 {strides = array<i32>} : memref<1x2x8xf32, #tpu.memory_space<vmem>>, vector<1x2x8xf32>,
    %18 = arith.truncf %4 : vector<32x8xf32> to vector<32x8xbf16>
    %19 = vector.shape_cast %18 : vector<32x8xbf16> to vector<1x4x8x8xbf16>
    %c0_14 = arith.constant 0 : index
    %c0_15 = arith.constant 0 : index
    %c0_16 = arith.constant 0 : index
    %c0_17 = arith.constant 0 : index
    %20 = vector.load %arg4[%c0_14, %c0_15, %c0_16, %c0_17] : memref<1x4x8x8xbf16, #tpu.memory_space<vmem>>, vector<1x4x8x8xbf16>
    tpu.vector_store %arg4[%c0_14, %c0_15, %c0_16, %c0_17], %19 {strides = array<i32>} : memref<1x4x8x8xbf16, #tpu.memory_space<vmem>>, vector<1x4x8x8xbf16>,
    return
  }
  func.func @transform_0(%arg0: i32, %arg1: i32) -> (i32, i32, i32, i32) {
    %c0_i32 = arith.constant 0 : i32
    %c0_i32_0 = arith.constant 0 : i32
    %c0_i32_1 = arith.constant 0 : i32
    return %arg0, %arg1, %c0_i32, %c0_i32_0 : i32, i32, i32, i32
  }
  func.func @transform_1(%arg0: i32, %arg1: i32) -> (i32, i32) {
    %c0_i32 = arith.constant 0 : i32
    %c0_i32_0 = arith.constant 0 : i32
    %c0_i32_1 = arith.constant 0 : i32
    return %c0_i32, %c0_i32_0 : i32, i32
  }
  func.func @transform_2(%arg0: i32, %arg1: i32) -> (i32, i32, i32, i32) {
    %c0_i32 = arith.constant 0 : i32
    %c0_i32_0 = arith.constant 0 : i32
    %c0_i32_1 = arith.constant 0 : i32
    return %arg0, %arg1, %c0_i32, %c0_i32_0 : i32, i32, i32, i32
  }
  func.func @transform_3(%arg0: i32, %arg1: i32) -> (i32, i32, i32) {
    %c0_i32 = arith.constant 0 : i32
    %c0_i32_0 = arith.constant 0 : i32
    %c0_i32_1 = arith.constant 0 : i32
    return %arg0, %c0_i32, %c0_i32_0 : i32, i32, i32
  }
}

module attributes {stable_mosaic.version = 11 : i64} {
  func.func @_bn_residual_kernel(%arg0: i32, %arg1: i32, %arg2: memref<1x4x8x32xbf16, #tpu.memory_space<vmem>>, %arg3: memref<1x32xf32, #tpu.memory_space<vmem>>, %arg4: memref<1x32xf32, #tpu.memory_space<vmem>>, %arg5: memref<1x4x8x32xf32, #tpu.memory_space<vmem>>, %arg6: memref<1x4x8x32xf32, #tpu.memory_space<vmem>>) attributes {dimension_semantics = [#tpu.dimension_semantics<parallel>, #tpu.dimension_semantics<parallel>], iteration_bounds = array<i64: 2, 2>, scalar_prefetch = 0 : i64, scratch_operands = 0 : i64, tpu.core_type = #tpu.core_type<tc>, window_params = [{transform_indices = @transform_0, window_bounds = array<i64: 1, 4, 8, 32>}, {pipeline_mode = #tpu.pipeline_mode<synchronous>, transform_indices = @transform_1, window_bounds = array<i64: 1, 32>}, {pipeline_mode = #tpu.pipeline_mode<synchronous>, transform_indices = @transform_2, window_bounds = array<i64: 1, 32>}, {transform_indices = @transform_3, window_bounds = array<i64: 1, 4, 8, 32>}, {transform_indices = @transform_4, window_bounds = array<i64: 1, 4, 8, 32>}]} {
    %c0 = arith.constant 0 : index
    %c0_0 = arith.constant 0 : index
    %c0_1 = arith.constant 0 : index
    %c0_2 = arith.constant 0 : index
    %0 = vector.load %arg2[%c0, %c0_0, %c0_1, %c0_2] : memref<1x4x8x32xbf16, #tpu.memory_space<vmem>>, vector<1x4x8x32xbf16>
    %1 = vector.shape_cast %0 : vector<1x4x8x32xbf16> to vector<32x32xbf16>
    %2 = arith.extf %1 : vector<32x32xbf16> to vector<32x32xf32>
    %c0_3 = arith.constant 0 : index
    %c0_4 = arith.constant 0 : index
    %3 = vector.load %arg3[%c0_3, %c0_4] : memref<1x32xf32, #tpu.memory_space<vmem>>, vector<1x32xf32>
    %4 = vector.broadcast %3 : vector<1x32xf32> to vector<32x32xf32>
    %5 = arith.mulf %2, %4 : vector<32x32xf32>
    %c0_5 = arith.constant 0 : index
    %c0_6 = arith.constant 0 : index
    %6 = vector.load %arg4[%c0_5, %c0_6] : memref<1x32xf32, #tpu.memory_space<vmem>>, vector<1x32xf32>
    %7 = vector.broadcast %6 : vector<1x32xf32> to vector<32x32xf32>
    %8 = arith.addf %5, %7 : vector<32x32xf32>
    %c0_7 = arith.constant 0 : index
    %c0_8 = arith.constant 0 : index
    %c0_9 = arith.constant 0 : index
    %c0_10 = arith.constant 0 : index
    %9 = vector.load %arg5[%c0_7, %c0_8, %c0_9, %c0_10] : memref<1x4x8x32xf32, #tpu.memory_space<vmem>>, vector<1x4x8x32xf32>
    %10 = vector.shape_cast %9 : vector<1x4x8x32xf32> to vector<32x32xf32>
    %11 = arith.addf %8, %10 : vector<32x32xf32>
    %cst = arith.constant 0.000000e+00 : f32
    %12 = vector.broadcast %cst : f32 to vector<32x32xf32>
    %13 = arith.maximumf %11, %12 : vector<32x32xf32>
    %14 = vector.shape_cast %13 : vector<32x32xf32> to vector<1x4x8x32xf32>
    %c0_11 = arith.constant 0 : index
    %c0_12 = arith.constant 0 : index
    %c0_13 = arith.constant 0 : index
    %c0_14 = arith.constant 0 : index
    %15 = vector.load %arg6[%c0_11, %c0_12, %c0_13, %c0_14] : memref<1x4x8x32xf32, #tpu.memory_space<vmem>>, vector<1x4x8x32xf32>
    tpu.vector_store %arg6[%c0_11, %c0_12, %c0_13, %c0_14], %14 {strides = array<i32>} : memref<1x4x8x32xf32, #tpu.memory_space<vmem>>, vector<1x4x8x32xf32>,
    return
  }
  func.func @transform_0(%arg0: i32, %arg1: i32) -> (i32, i32, i32, i32) {
    %c0_i32 = arith.constant 0 : i32
    %c0_i32_0 = arith.constant 0 : i32
    %c0_i32_1 = arith.constant 0 : i32
    return %arg0, %arg1, %c0_i32, %c0_i32_0 : i32, i32, i32, i32
  }
  func.func @transform_1(%arg0: i32, %arg1: i32) -> (i32, i32) {
    %c0_i32 = arith.constant 0 : i32
    %c0_i32_0 = arith.constant 0 : i32
    %c0_i32_1 = arith.constant 0 : i32
    return %c0_i32, %c0_i32_0 : i32, i32
  }
  func.func @transform_2(%arg0: i32, %arg1: i32) -> (i32, i32) {
    %c0_i32 = arith.constant 0 : i32
    %c0_i32_0 = arith.constant 0 : i32
    %c0_i32_1 = arith.constant 0 : i32
    return %c0_i32, %c0_i32_0 : i32, i32
  }
  func.func @transform_3(%arg0: i32, %arg1: i32) -> (i32, i32, i32, i32) {
    %c0_i32 = arith.constant 0 : i32
    %c0_i32_0 = arith.constant 0 : i32
    %c0_i32_1 = arith.constant 0 : i32
    return %arg0, %arg1, %c0_i32, %c0_i32_0 : i32, i32, i32, i32
  }
  func.func @transform_4(%arg0: i32, %arg1: i32) -> (i32, i32, i32, i32) {
    %c0_i32 = arith.constant 0 : i32
    %c0_i32_0 = arith.constant 0 : i32
    %c0_i32_1 = arith.constant 0 : i32
    return %arg0, %arg1, %c0_i32, %c0_i32_0 : i32, i32, i32, i32
  }
}

</mosaic_0001>

<bundles_post_ra>
// kernel: bottleneck_forward_nhwc.4
= control target key start
LH: loop header
LB: loop body
LE: loop exit
PB: predicated region body
PF: predicated region fallthrough
CT: control target
= control target key end

     0   :  { %s574_s12 = smov 0   ;;  %s576_s13 = smov 0   ;;  %s649_s0 = inlined_call_operand.vmem [shape: f32[2,8,8,32], index: 0, kind: input, shape index: {}]   ;;  %s650_s1 = inlined_call_operand.vmem [shape: bf16[32,8], index: 1, kind: input, shape index: {}]   ;;  %s651_s2 = inlined_call_operand.vmem [shape: bf16[2,8,8,8], index: 2, kind: output, shape index: {0}]   ;;  %s652_s3 = inlined_call_operand.vmem [shape: f32[2,2,8], index: 3, kind: output, shape index: {1}]  }
   0x1   :  { %s578_s14 = smov 0   ;;  %s580_s15 = smov 0  }
   0x2   :  { %s582_s16 = smov 0  }
   0x3 LB: > { %s23_s17 = sadd.s32 1, %s543_s14  ;;  %s26_s18 = sadd.s32 1, %s547_s15  ;;  %s551_s16 = sphi %s582_s16, %s14_s16   ;;  %s547_s15 = sphi %s580_s15, %s656_s15   ;;  %s543_s14 = sphi %s578_s14, %s655_s14   ;;  %s539_s13 = sphi %s576_s13, %s654_s13   ;;  %s535_s12 = sphi %s574_s12, %s653_s12  }
   0x4   : > { %p24_p0 = scmp.ge.s32.totalorder %s23_s17, 2  ;;  %p447_p1 = scmp.ge.s32.totalorder %s551_s16, 1 }
   0x5   : > { %p161_p2 = scmp.lt.s32.totalorder %s551_s16, 5 }
   0x6   : > { %s658_s17 = smov (%p24_p0, %s23_s17), 0  ;;  %s660_s18 = smov (!%p24_p0, %s26_s18), %s547_s15 }
   0x7   : > { %p162_p3 = pnand %p447_p1, %p161_p2  ;;  %p28_p4 = scmp.ge.s32.totalorder %s660_s18, 2 }
   0x8   : > { %s448_s21 = sshll.u32 (!%p162_p3), %s535_s12, 2  ;;  %p198_p5 = scmp.lt.s32.totalorder (!%p162_p3), %s539_s13, 1 }
   0x9   : > { %s662_s18 = smov (%p28_p4, %s660_s18), 0  ;;  %165 = sbr.rel (%p162_p3) target bundleno = 184 (0xb8), region = 28 }
   0xa   : > { %p200_p6 = scmp.lt.s32.totalorder (!%p162_p3), %s448_s21, 7  ;;  %p465_p7 = scmp.ne.s32.totalorder (!%p162_p3), %s535_s12, 0 }
   0xe   : > { %v469_v0 = vld [vmem:[%s650_s1 + $0x8] sm:$0xff]  ;;  %v468_v1 = vld [vmem:[%s650_s1] sm:$0xff]  ;;  %s664_s13 = smov (!%p198_p5, %s539_s13), 1  ;;  %s666_s21 = smov (!%p200_p6, %s448_s21), 7  ;;  %vm244_vm0 = vcmask 261120  }
   0xf   : > { %257 = vmatpush.bf16.msra.mxu0 %v469_v0  ;;  %470 = vmatpush.bf16.msra.mxu1 %v469_v0  ;;  %s449_s24 = sshll.u32 %s664_s13, 3  ;;  %s454_s25 = sshll.u32 %s664_s13, 1 }
  0x10   : > { %s203_s26 = sadd.s32 %s449_s24, %s666_s21  ;;  %s616_s29 = scalar_lea.vmem %s652_s3, %s454_s25 }
  0x11   : > { %s450_s30 = sshll.u32 %s203_s26, 3  ;;  %s453_s4 = sshll.u32 %s203_s26, 2 }
  0x12   : > { %s205_s7 = scalar_lea.vmem %s649_s0, %s450_s30  ;;  %s624_s10 = scalar_lea.vmem %s651_s2, %s453_s4 }
  0x13   : > { %258 = vmatpush.bf16.msra.mxu0 %v468_v1  ;;  %471 = vmatpush.bf16.msra.mxu1 %v468_v1  ;;  %v222_v2 = vld [vmem:[%s205_s7] sm:$0xff]  ;;  %v223_v3 = vld [vmem:[%s205_s7 + $0x8] sm:$0xff]  ;;  %v224_v4 = vld [vmem:[%s205_s7 + $0x10] sm:$0xff] }
  0x14   : > { %v226_v5 = vpack.c.bf16 %v223_v3, %v222_v2  ;;  %v225_v6 = vld [vmem:[%s205_s7 + $0x18] sm:$0xff] }
  0x15   : > { %v227_v7 = vpack.c.bf16 %v225_v6, %v224_v4 }
  0x16   : > { %463 = vmatmul.msk.bf16.vlgmr.msra.gmra.mxu0 %vm244_vm0, %v226_v5 }
  0x17   : > { %464 = vmatmul.msk.bf16.vlgmr.msra.gmra.mxu1 %vm244_vm0, %v227_v7 }
  0x93   : > { %v260_v8 = vpop.f32.mrf.mxu0 }
  0x94   : > { %v265_v9 = vpop.f32.mrf.mxu1 }
  0x98   : > { %273 = sbr.rel (%p465_p7) target bundleno = 159 (0x9f), region = 32 }
  0x9b   : > { %v262_v10 = vpop.f32.mrf.mxu0 }
  0x9c   : > { %v267_v11 = vpop.f32.mrf.mxu1 }
  0x9d   : > { %vm274_vm1 = vcmask 58368   ;;  %v553_v12 = vmov 0.0  }
  0x9e   : > { %275 = vst.msk [vmem:[%s616_s29] sm:$0x3] %vm274_vm1, %v553_v12 }
  0x9f PF: > { %vm277_vm2 = vcmask 64512   ;;  %v291_v13 = vmul.f32 %v260_v8, %v260_v8  ;;  %v292_v14 = vmul.f32 %v262_v10, %v262_v10  ;;  %v293_v15 = vmul.f32 %v265_v9, %v265_v9 }
  0xa0   : > { %v278_v16 = vsel %vm277_vm2, %v260_v8, 0.0  ;;  %v279_v17 = vsel %vm277_vm2, %v262_v10, 0.0  ;;  %v281_v18 = vsel %vm277_vm2, %v265_v9, 0.0  ;;  %v294_v20 = vmul.f32 %v267_v11, %v267_v11 }
  0xa1   : > { %v280_v19 = vadd.f32 %v279_v17, %v278_v16  ;;  %v295_v21 = vsel %vm277_vm2, %v291_v13, 0.0  ;;  %v296_v22 = vsel %vm277_vm2, %v292_v14, 0.0  ;;  %v283_v23 = vsel %vm277_vm2, %v267_v11, 0.0 }
  0xa2   : > { %v297_v24 = vadd.f32 %v296_v22, %v295_v21  ;;  %v298_v25 = vsel %vm277_vm2, %v293_v15, 0.0  ;;  %v300_v27 = vsel %vm277_vm2, %v294_v20, 0.0  ;;  %v313_v28 = vpack.c.bf16 %v260_v8, %v260_v8 }
  0xa3   : > { %v282_v26 = vadd.f32 %v281_v18, %v280_v19  ;;  %vm317_vm3 = vcmask 60416   ;;  %v314_v30 = vpack.c.bf16 %v262_v10, %v262_v10  ;;  %v315_v31 = vpack.c.bf16 %v265_v9, %v265_v9 }
  0xa4   : > { %v299_v29 = vadd.f32 %v298_v25, %v297_v24  ;;  %v316_v32 = vpack.c.bf16 %v267_v11, %v267_v11  ;;  %318 = vst.msk [vmem:[%s624_s10] sm:$0xf] %vm317_vm3, %v313_v28  ;;  %vm308_vm4 = vcmask 1040384   ;;  %vm311_vm5 = vcmask 58368  }
  0xa5   : > { %v284_v33 = vadd.f32 %v283_v23, %v282_v26  ;;  %319 = vst.msk [vmem:[%s624_s10 + $0x4] sm:$0xf] %vm317_vm3, %v314_v30  ;;  %v276_v46 = vld [vmem:[%s616_s29] sm:$0x3] }
  0xa6   : > { %v301_v34 = vadd.f32 %v300_v27, %v299_v29  ;;  %320 = vst.msk [vmem:[%s624_s10 + $0x8] sm:$0xf] %vm317_vm3, %v315_v31 }
  0xa7   : > { %v285_v35 = vrot.slane %v284_v33, 4  ;;  %321 = vst.msk [vmem:[%s624_s10 + $0xc] sm:$0xf] %vm317_vm3, %v316_v32 }
  0xa8   : > { %v302_v36 = vrot.slane %v301_v34, 4 }
  0xa9   : > { %v286_v37 = vadd.f32 %v285_v35, %v284_v33 }
  0xaa   : > { %v303_v38 = vadd.f32 %v302_v36, %v301_v34 }
  0xab   : > { %v287_v39 = vrot.slane %v286_v37, 2 }
  0xac   : > { %v304_v40 = vrot.slane %v303_v38, 2 }
  0xad   : > { %v288_v41 = vadd.f32 %v287_v39, %v286_v37 }
  0xae   : > { %v305_v42 = vadd.f32 %v304_v40, %v303_v38 }
  0xaf   : > { %v289_v43 = vrot.slane %v288_v41, 1 }
  0xb0   : > { %v306_v44 = vrot.slane %v305_v42, 1 }
  0xb1   : > { %v290_v45 = vadd.f32 %v289_v43, %v288_v41 }
  0xb2   : > { %v307_v47 = vadd.f32 %v306_v44, %v305_v42 }
  0xb4   : > { %v309_v48 = vsel %vm308_vm4, %v290_v45, %v307_v47 }
  0xb5   : > { %v310_v49 = vadd.f32 %v309_v48, %v276_v46 }
  0xb7   : > { %312 = vst.msk [vmem:[%s616_s29] sm:$0x3] %vm311_vm5, %v310_v49 }
  0xb8 PF: > { %s14_s16 = sadd.s32 1, %s551_s16   ;;  %s653_s12 = smov %s543_s14 }
  0xb9   : > { %p11_p8 = scmp.ge.s32.totalorder %s14_s16, 6   ;;  %s654_s13 = smov %s547_s15 }
  0xba   : > { %s655_s14 = smov %s658_s17  ;;  %s656_s15 = smov %s662_s18 }
  0xbb   :  { %13 = sbr.rel (!%p11_p8) target bundleno = 3 (0x3), region = 74 }

// kernel: bottleneck_forward_nhwc.6
= control target key start
LH: loop header
LB: loop body
LE: loop exit
PB: predicated region body
PF: predicated region fallthrough
CT: control target
= control target key end

     0   :  { %s651_s18 = smov 0   ;;  %s653_s19 = smov 0   ;;  %s729_s0 = inlined_call_operand.vmem [shape: bf16[2,8,8,8], index: 0, kind: input, shape index: {}]   ;;  %s730_s1 = inlined_call_operand.vmem [shape: f32[1,8], index: 1, kind: input, shape index: {}]   ;;  %s731_s2 = inlined_call_operand.vmem [shape: f32[1,8], index: 2, kind: input, shape index: {}]   ;;  %s732_s3 = inlined_call_operand.vmem [shape: bf16[8,32], index: 3, kind: input, shape index: {}]   ;;  %s733_s4 = inlined_call_operand.vmem [shape: bf16[2,8,8,32], index: 4, kind: output, shape index: {0}]   ;;  %s734_s5 = inlined_call_operand.vmem [shape: f32[2,2,32], index: 5, kind: output, shape index: {1}]  }
   0x1   :  { %s655_s20 = smov 0   ;;  %s657_s21 = smov 0  }
   0x2   :  { %s659_s22 = smov 0  }
   0x3 LB: > { %s25_s23 = sadd.s32 1, %s610_s20  ;;  %s28_s24 = sadd.s32 1, %s614_s21  ;;  %s618_s22 = sphi %s659_s22, %s16_s22   ;;  %s614_s21 = sphi %s657_s21, %s738_s21   ;;  %s610_s20 = sphi %s655_s20, %s737_s20   ;;  %s606_s19 = sphi %s653_s19, %s736_s19   ;;  %s602_s18 = sphi %s651_s18, %s735_s18  }
   0x4   : > { %p26_p0 = scmp.ge.s32.totalorder %s25_s23, 2  ;;  %p514_p1 = scmp.ge.s32.totalorder %s618_s22, 1 }
   0x5   : > { %p211_p2 = scmp.lt.s32.totalorder %s618_s22, 5 }
   0x6   : > { %s740_s23 = smov (%p26_p0, %s25_s23), 0  ;;  %s742_s24 = smov (!%p26_p0, %s28_s24), %s614_s21 }
   0x7   : > { %p212_p3 = pnand %p514_p1, %p211_p2  ;;  %p30_p4 = scmp.ge.s32.totalorder %s742_s24, 2 }
   0x8   : > { %s515_s27 = sshll.u32 (!%p212_p3), %s602_s18, 2  ;;  %p252_p5 = scmp.lt.s32.totalorder (!%p212_p3), %s606_s19, 1 }
   0x9   : > { %s744_s24 = smov (%p30_p4, %s742_s24), 0  ;;  %215 = sbr.rel (%p212_p3) target bundleno = 191 (0xbf), region = 36 }
   0xa   : > { %p254_p6 = scmp.lt.s32.totalorder (!%p212_p3), %s515_s27, 7  ;;  %p524_p7 = scmp.ne.s32.totalorder (!%p212_p3), %s602_s18, 0 }
   0xe   : > { %v306_v0 = vld [vmem:[%s732_s3] sm:$0xf]  ;;  %vm314_vm0 = vcmask 1043456   ;;  %s746_s19 = smov (!%p252_p5, %s606_s19), 1  ;;  %s748_s27 = smov (!%p254_p6, %s515_s27), 7  ;;  %vm307_vm1 = vcmask 64512  }
   0xf   : > { %v316_v1 = vsel %vm314_vm0, %v306_v0, 0  ;;  %s516_s28 = sshll.u32 %s746_s19, 3  ;;  %s521_s29 = sshll.u32 %s746_s19, 1  ;;  %v578_v2 = vld [vmem:[%s730_s1] ss:$0 sm:$0xff] }
  0x10   : > { %325 = vmatpush.bf16.msra.mxu0 %v316_v1  ;;  %536 = vmatpush.bf16.msra.mxu1 %v316_v1  ;;  %s257_s30 = sadd.s32 %s516_s28, %s748_s27  ;;  %s690_s8 = scalar_lea.vmem %s734_s5, %s521_s29  ;;  %v579_v7 = vld [vmem:[%s731_s2] ss:$0 sm:$0xff] }
  0x11   : > { %s517_s9 = sshll.u32 %s257_s30, 2 }
  0x12   : > { %s259_s12 = scalar_lea.vmem %s729_s0, %s517_s9  ;;  %s698_s15 = scalar_lea.vmem %s733_s4, %s517_s9 }
  0x13   : > { %v528_v3 = vld [vmem:[%s259_s12] sm:$0xff]   ;;  %v535_v4 = vld [vmem:[%s259_s12 + $0x8] sm:$0xff]  }
  0x14   : > { %v529_v5 = vunpack.c.l.bf16 %v528_v3  ;;  %v530_v6 = vunpack.c.h.bf16 %v528_v3  ;;  %v533_v8 = vunpack.c.l.bf16 %v535_v4  ;;  %v534_v9 = vunpack.c.h.bf16 %v535_v4 }
  0x16   : > { %v288_v10 = vmul.f32 %v578_v2, %v529_v5  ;;  %v289_v11 = vmul.f32 %v578_v2, %v530_v6  ;;  %v290_v12 = vmul.f32 %v578_v2, %v533_v8  ;;  %v291_v13 = vmul.f32 %v578_v2, %v534_v9 }
  0x18   : > { %v296_v14 = vadd.f32 %v579_v7, %v288_v10  ;;  %v297_v15 = vadd.f32 %v579_v7, %v289_v11  ;;  %v298_v16 = vadd.f32 %v579_v7, %v290_v12  ;;  %v299_v17 = vadd.f32 %v579_v7, %v291_v13 }
  0x1a   : > { %v300_v18 = vmax.f32 %v296_v14, 0.0  ;;  %v301_v19 = vmax.f32 %v297_v15, 0.0  ;;  %v302_v20 = vmax.f32 %v298_v16, 0.0  ;;  %v303_v21 = vmax.f32 %v299_v17, 0.0 }
  0x1c   : > { %v304_v22 = vpack.c.bf16 %v301_v19, %v300_v18  ;;  %v305_v23 = vpack.c.bf16 %v303_v21, %v302_v20 }
  0x1e   : > { %522 = vmatmul.msk.bf16.vlgmr.msra.gmra.mxu0 %vm307_vm1, %v304_v22  ;;  %523 = vmatmul.msk.bf16.vlgmr.msra.gmra.mxu1 %vm307_vm1, %v305_v23 }
  0x9b   : > { %v327_v24 = vpop.f32.mrf.mxu0  ;;  %v332_v25 = vpop.f32.mrf.mxu1 }
  0x9f   : > { %340 = sbr.rel (%p524_p7) target bundleno = 166 (0xa6), region = 40 }
  0xa3   : > { %v329_v26 = vpop.f32.mrf.mxu0  ;;  %v334_v27 = vpop.f32.mrf.mxu1 }
  0xa4   : > { %vm341_vm2 = vcmask 254976   ;;  %v620_v28 = vmov 0.0  }
  0xa5   : > { %342 = vst.msk [vmem:[%s690_s8] sm:$0x3] %vm341_vm2, %v620_v28 }
  0xa6 PF: > { %vm344_vm3 = vcmask 261120   ;;  %v358_v29 = vmul.f32 %v327_v24, %v327_v24  ;;  %v359_v30 = vmul.f32 %v329_v26, %v329_v26  ;;  %v360_v31 = vmul.f32 %v332_v25, %v332_v25 }
  0xa7   : > { %v345_v32 = vsel %vm344_vm3, %v327_v24, 0.0  ;;  %v346_v33 = vsel %vm344_vm3, %v329_v26, 0.0  ;;  %v348_v34 = vsel %vm344_vm3, %v332_v25, 0.0  ;;  %v361_v36 = vmul.f32 %v334_v27, %v334_v27 }
  0xa8   : > { %v347_v35 = vadd.f32 %v346_v33, %v345_v32  ;;  %v362_v37 = vsel %vm344_vm3, %v358_v29, 0.0  ;;  %v363_v38 = vsel %vm344_vm3, %v359_v30, 0.0  ;;  %v350_v39 = vsel %vm344_vm3, %v334_v27, 0.0 }
  0xa9   : > { %v364_v40 = vadd.f32 %v363_v38, %v362_v37  ;;  %v365_v41 = vsel %vm344_vm3, %v360_v31, 0.0  ;;  %v367_v43 = vsel %vm344_vm3, %v361_v36, 0.0  ;;  %v380_v44 = vpack.c.bf16 %v327_v24, %v327_v24 }
  0xaa   : > { %v349_v42 = vadd.f32 %v348_v34, %v347_v35  ;;  %vm384_vm4 = vcmask 257024   ;;  %v381_v46 = vpack.c.bf16 %v329_v26, %v329_v26  ;;  %v382_v47 = vpack.c.bf16 %v332_v25, %v332_v25 }
  0xab   : > { %v366_v45 = vadd.f32 %v365_v41, %v364_v40  ;;  %v383_v48 = vpack.c.bf16 %v334_v27, %v334_v27  ;;  %385 = vst.msk [vmem:[%s698_s15] sm:$0xf] %vm384_vm4, %v380_v44  ;;  %vm375_vm5 = vcmask 1040384   ;;  %vm378_vm6 = vcmask 254976  }
  0xac   : > { %v351_v49 = vadd.f32 %v350_v39, %v349_v42  ;;  %386 = vst.msk [vmem:[%s698_s15 + $0x4] sm:$0xf] %vm384_vm4, %v381_v46  ;;  %v343_v62 = vld [vmem:[%s690_s8] sm:$0x3] }
  0xad   : > { %v368_v50 = vadd.f32 %v367_v43, %v366_v45  ;;  %387 = vst.msk [vmem:[%s698_s15 + $0x8] sm:$0xf] %vm384_vm4, %v382_v47 }
  0xae   : > { %v352_v51 = vrot.slane %v351_v49, 4  ;;  %388 = vst.msk [vmem:[%s698_s15 + $0xc] sm:$0xf] %vm384_vm4, %v383_v48 }
  0xaf   : > { %v369_v52 = vrot.slane %v368_v50, 4 }
  0xb0   : > { %v353_v53 = vadd.f32 %v352_v51, %v351_v49 }
  0xb1   : > { %v370_v54 = vadd.f32 %v369_v52, %v368_v50 }
  0xb2   : > { %v354_v55 = vrot.slane %v353_v53, 2 }
  0xb3   : > { %v371_v56 = vrot.slane %v370_v54, 2 }
  0xb4   : > { %v355_v57 = vadd.f32 %v354_v55, %v353_v53 }
  0xb5   : > { %v372_v58 = vadd.f32 %v371_v56, %v370_v54 }
  0xb6   : > { %v356_v59 = vrot.slane %v355_v57, 1 }
  0xb7   : > { %v373_v60 = vrot.slane %v372_v58, 1 }
  0xb8   : > { %v357_v61 = vadd.f32 %v356_v59, %v355_v57 }
  0xb9   : > { %v374_v63 = vadd.f32 %v373_v60, %v372_v58 }
  0xbb   : > { %v376_v0 = vsel %vm375_vm5, %v357_v61, %v374_v63 }
  0xbc   : > { %v377_v1 = vadd.f32 %v376_v0, %v343_v62 }
  0xbe   : > { %379 = vst.msk [vmem:[%s690_s8] sm:$0x3] %vm378_vm6, %v377_v1 }
  0xbf PF: > { %s16_s22 = sadd.s32 1, %s618_s22   ;;  %s735_s18 = smov %s610_s20 }
  0xc0   : > { %p13_p8 = scmp.ge.s32.totalorder %s16_s22, 6   ;;  %s736_s19 = smov %s614_s21 }
  0xc1   : > { %s737_s20 = smov %s740_s23  ;;  %s738_s21 = smov %s744_s24 }
  0xc2   :  { %15 = sbr.rel (!%p13_p8) target bundleno = 3 (0x3), region = 82 }

// kernel: bottleneck_forward_nhwc.7
= control target key start
LH: loop header
LB: loop body
LE: loop exit
PB: predicated region body
PF: predicated region fallthrough
CT: control target
= control target key end

     0   :  { %9 = vsyncpa [#allocation3], 0  ;;  %s780_s0 = inlined_call_operand.vmem [shape: bf16[2,8,8,32], index: 0, kind: input, shape index: {}]   ;;  %s781_s1 = inlined_call_operand.vmem [shape: f32[1,32], index: 1, kind: input, shape index: {}]   ;;  %s782_s2 = inlined_call_operand.vmem [shape: f32[1,32], index: 2, kind: input, shape index: {}]   ;;  %s783_s3 = inlined_call_operand.vmem [shape: f32[2,8,8,32], index: 3, kind: input, shape index: {}]   ;;  %s784_s4 = inlined_call_operand.hbm [shape: f32[2,8,8,32], index: 4, kind: output, shape index: {}]  }
   0x1   :  { %11 = vsyncpa [#allocation3 + $0x1], 0  ;;  %s647_s15 = smov 0   ;;  %s649_s16 = smov 0  }
   0x2   :  { %s651_s17 = smov 0   ;;  %s653_s18 = smov 0  }
   0x3   :  { %s655_s19 = smov 0   ;;  %s657_s20 = smov 0  }
   0x4   :  { %s659_s21 = smov 0   ;;  %s661_s22 = smov 0  }
   0x5 LB: > { %789 = sst [smem:[#allocation5_spill]] %s610_s20  ;;  %s422_s23 = sadd.s32 4294967295, %s618_s22   ;;  %s618_s22 = sphi %s661_s22, %s17_s22   ;;  %s614_s21 = sphi %s659_s21, %s798_s21   ;;  %s610_s20 = sphi %s657_s20, %s797_s20   ;;  %s606_s19 = sphi %s655_s19, %s796_s19   ;;  %s602_s18 = sphi %s653_s18, %s795_s18   ;;  %s598_s17 = sphi %s651_s17, %s801_s17   ;;  %s594_s16 = sphi %s649_s16, %s800_s16   ;;  %s590_s15 = sphi %s647_s15, %s799_s15  }
   0x6   : > { %790 = sst [smem:[#allocation6_spill]] %s614_s21  ;;  %s423_s24 = sadd.s32 4294967294, %s618_s22  }
   0x7   : > { %s26_s25 = sadd.s32 1, %s610_s20  ;;  %s29_s26 = sadd.s32 1, %s614_s21 }
   0x8   : > { %p27_p0 = scmp.ge.s32.totalorder %s26_s25, 2  ;;  %p146_p1 = scmp.ne.s32.totalorder %s598_s17, %s594_s16 }
   0x9   : > { %p147_p2 = scmp.eq.s32.totalorder %s422_s23, 3  ;;  %p152_p5 = scmp.ne.s32.totalorder %s594_s16, %s590_s15 }
   0xa   : > { %s803_s25 = smov (%p27_p0, %s26_s25), 0  ;;  %s805_s26 = smov (!%p27_p0, %s29_s26), %s614_s21 }
   0xb   : > { %791 = sst [smem:[#allocation7_spill]] %s803_s25  ;;  %s132_s27 = ssub.s32 %s610_s20, %s803_s25 }
   0xc   : > { %p698_p3 = por %p147_p2, %p146_p1  ;;  %p31_p4 = scmp.ge.s32.totalorder %s805_s26, 2 }
   0xd   : > { %p153_p6 = scmp.eq.s32.totalorder %s423_s24, 3  ;;  %p426_p7 = scmp.ge.s32.totalorder %s618_s22, 1 }
   0xe   : > { %s807_s26 = smov (%p31_p4, %s805_s26), 0  ;;  %p203_p9 = scmp.lt.s32.totalorder %s618_s22, 5 }
   0xf   : > { %793 = sst [smem:[#allocation8_spill]] %s807_s26  ;;  %p707_p8 = por %p153_p6, %p152_p5 }
  0x10   : > { %s131_s30 = ssub.s32 %s614_s21, %s807_s26  ;;  %s136_s5 = sadd.s32 1, %s598_s17 }
  0x11   : > { %s133_s6 = sor.u32 %s132_s27, %s131_s30  ;;  %p204_p10 = pnand %p426_p7, %p203_p9 }
  0x12   : > { %p134_p11 = scmp.eq.s32.totalorder %s133_s6, 0  ;;  %s428_s8 = sshll.u32 (!%p204_p10), %s602_s18, 2 }
  0x13   : > { %207 = sbr.rel (%p204_p10) target bundleno = 48 (0x30), region = 36  ;;  %p243_p12 = scmp.lt.s32.totalorder (!%p204_p10), %s606_s19, 1 }
  0x14   : > { %s716_s7 = scalar_select %p134_p11, %s598_s17, %s136_s5  }
  0x15   : > { %p245_p13 = scmp.lt.s32.totalorder (!%p204_p10), %s428_s8, 7  ;;  %s436_s13 = sshll.u32 (!%p204_p10), %s606_s19, 3 }
  0x16   : > { %s239_s24 = sand.u32 (!%p204_p10), 1, %s594_s16   ;;  %s316_s18 = sadd.s32 (!%p204_p10), %s436_s13, %s428_s8 }
  0x17   : > { %s437_s26 = sshll.u32 (!%p204_p10), %s316_s18, 3 }
  0x18   : > { %s244_s9 = scalar_select %p243_p12, %s606_s19, 1  ;;  %v522_v0 = vld [vmem:[%s781_s1] ss:$0 sm:$0xff]  ;;  %vm299_vm0 = vcmask 261120  }
  0x19   : > { %s246_s10 = scalar_select %p245_p13, %s428_s8, 7  ;;  %v523_v3 = vld [vmem:[%s782_s2] ss:$0 sm:$0xff] }
  0x1a   : > { %s429_s11 = sshll.u32 %s244_s9, 3  ;;  %s318_s8 = scalar_lea.hbm %s784_s4, %s437_s26 }
  0x1b   : > { %s248_s12 = sadd.s32 %s429_s11, %s246_s10  ;;  %s427_s10 = sshll.u32 %s239_s24, 5 }
  0x1c   : > { %s430_s14 = sshll.u32 %s248_s12, 2  ;;  %s433_s23 = sshll.u32 %s248_s12, 3 }
  0x1d   : > { %s250_s5 = scalar_lea.vmem %s780_s0, %s430_s14  ;;  %s260_s20 = scalar_lea.vmem %s783_s3, %s433_s23 }
  0x1e   : > { %v441_v1 = vld [vmem:[%s250_s5] sm:$0xff]   ;;  %v448_v5 = vld [vmem:[%s250_s5 + $0x8] sm:$0xff]   ;;  %v289_v16 = vld [vmem:[%s260_s20 + $0x10] sm:$0xff]  ;;  %s241_s11 = scalar_lea.vmem [#allocation2], %s427_s10  ;;  %s321_s13 = sshll.u32 %s318_s8, 4  ;;  %s322_s13 = int_to_ptr.hbm [resolvable:$true] %s321_s13 }
  0x1f   : > { %v442_v2 = vunpack.c.l.bf16 %v441_v1  ;;  %v443_v4 = vunpack.c.h.bf16 %v441_v1  ;;  %v446_v6 = vunpack.c.l.bf16 %v448_v5  ;;  %v447_v7 = vunpack.c.h.bf16 %v448_v5  ;;  %v287_v10 = vld [vmem:[%s260_s20] sm:$0xff]  ;;  %v288_v11 = vld [vmem:[%s260_s20 + $0x8] sm:$0xff]  ;;  %v290_v17 = vld [vmem:[%s260_s20 + $0x18] sm:$0xff]  ;;  %s319_s12 = sshll.u32 %s241_s11, 4  ;;  %s305_s20 = scalar_lea.sflag [#allocation3], %s239_s24  ;;  %s320_s12 = int_to_ptr.vmem [resolvable:$true] %s319_s12 }
  0x20   : > { %s538_s14 = sshra.s32 %s322_s13, 4  ;;  %s544_s5 = scalar_lea.hbm %s784_s4, 128  ;;  %s539_s14 = int_to_ptr.hbm [resolvable:$true] %s538_s14 }
  0x21   : > { %v275_v8 = vmul.f32 %v522_v0, %v442_v2  ;;  %v276_v9 = vmul.f32 %v522_v0, %v443_v4  ;;  %v277_v12 = vmul.f32 %v522_v0, %v446_v6  ;;  %v278_v13 = vmul.f32 %v522_v0, %v447_v7  ;;  %s540_s23 = scalar_lea.hbm %s539_s14, 32  ;;  %p545_p4 = scmp.lt.s32.totalorder %s539_s14, %s784_s4 }
  0x22   : > { %p541_p0 = scmp.ne.s32.totalorder %s539_s14, %s540_s23  ;;  %p546_p5 = scmp.lt.s32.totalorder %s544_s5, %s540_s23 }
  0x23   : > { %v283_v14 = vadd.f32 %v523_v3, %v275_v8  ;;  %v284_v15 = vadd.f32 %v523_v3, %v276_v9  ;;  %v285_v18 = vadd.f32 %v523_v3, %v277_v12  ;;  %v286_v19 = vadd.f32 %v523_v3, %v278_v13 }
  0x24   : > { %p542_p1 = pnand %p541_p0, %p698_p3  ;;  %p547_p6 = por %p546_p5, %p545_p4 }
  0x25   : > { %v291_v20 = vadd.f32 %v287_v10, %v283_v14  ;;  %v292_v21 = vadd.f32 %v288_v11, %v284_v15  ;;  %v293_v22 = vadd.f32 %v289_v16, %v285_v18  ;;  %v294_v23 = vadd.f32 %v290_v17, %v286_v19 }
  0x26   : > { %p543_p2 = pneg %p542_p1 }
  0x27   : > { %v295_v24 = vmax.f32 %v291_v20, 0.0  ;;  %v296_v25 = vmax.f32 %v292_v21, 0.0  ;;  %v297_v26 = vmax.f32 %v293_v22, 0.0  ;;  %v298_v27 = vmax.f32 %v294_v23, 0.0 }
  0x28   : > { %p548_p7 = pnand %p547_p6, %p543_p2 }
  0x29   : > { %300 = vst.msk [vmem:[%s241_s11] sm:$0xff] %vm299_vm0, %v295_v24 }
  0x2a   : > { %301 = vst.msk [vmem:[%s241_s11 + $0x8] sm:$0xff] %vm299_vm0, %v296_v25 }
  0x2b   : > { %302 = vst.msk [vmem:[%s241_s11 + $0x10] sm:$0xff] %vm299_vm0, %v297_v26 }
  0x2c   : > { %303 = vst.msk [vmem:[%s241_s11 + $0x18] sm:$0xff] %vm299_vm0, %v298_v27 }
  0x2d   : > { %551 = shalt.err (!%p548_p7)
}
  0x2e   : > { %s620_s24 = smov 128   ;;  %s621_s9 = smov 8  }
  0x2f   : > { %449 = dma.vmem_to_hbm [thread:$0]  (%p698_p3), %s320_s12, 512, %s322_s13, %s305_s20, %s620_s24, %s620_s24, %s621_s9  }
  0x30 PF: > { %p455_p9 = scmp.ge.s32.totalorder %s618_s22, 2  ;;  %s336_s19 = sand.u32 1, %s590_s15  }
  0x31   : > { %s337_s10 = scalar_lea.sflag [#allocation3], %s336_s19 }
  0x32   : > { %p452_p10 = pnand %p455_p9, %p707_p8 }
  0x34   : > { %p453_p11 = pneg %p452_p10 }
  0x36   : > { %585 = dma.done.wait (%p453_p11), %s337_s10, 512  }
  0x37   : > { %587 = vsyncadd (%p453_p11), %s337_s10, 4294966784  ;;  %s17_s22 = sadd.s32 1, %s618_s22   ;;  %s795_s18 = sld [smem:[#allocation5_spill]] }
  0x38   : > { %p14_p12 = scmp.ge.s32.totalorder %s17_s22, 6   ;;  %s796_s19 = sld [smem:[#allocation6_spill]] }
  0x39   : > { %s797_s20 = sld [smem:[#allocation7_spill]]  ;;  %s799_s15 = smov %s594_s16 }
  0x3a   : > { %s798_s21 = sld [smem:[#allocation8_spill]]  ;;  %s800_s16 = smov %s598_s17 }
  0x3b   : > { %s801_s17 = smov %s716_s7  ;;  %16 = sbr.rel (!%p14_p12) target bundleno = 5 (0x5), region = 74 }
  0x40   :  { %343 = vsyncpa [#allocation3], 1 }
  0x41   :  { %345 = vsyncpa [#allocation3 + $0x1], 1 }

// kernel: bottleneck_forward_nhwc.5
= control target key start
LH: loop header
LB: loop body
LE: loop exit
PB: predicated region body
PF: predicated region fallthrough
CT: control target
= control target key end

     0   :  { %s1285_s24 = smov 0   ;;  %s1287_s25 = smov 0   ;;  %s1599_s0 = inlined_call_operand.vmem [shape: bf16[2,8,8,8], index: 0, kind: input, shape index: {}, may-alias: {0,1,2}]   ;;  %s1600_s1 = inlined_call_operand.vmem [shape: bf16[2,8,8,8], index: 1, kind: input, shape index: {}, may-alias: {0,1,2}]   ;;  %s1601_s2 = inlined_call_operand.vmem [shape: bf16[2,8,8,8], index: 2, kind: input, shape index: {}, may-alias: {0,1,2}]   ;;  %s1602_s3 = inlined_call_operand.vmem [shape: f32[1,8], index: 3, kind: input, shape index: {}]   ;;  %s1603_s4 = inlined_call_operand.vmem [shape: f32[1,8], index: 4, kind: input, shape index: {}]   ;;  %s1604_s5 = inlined_call_operand.vmem [shape: bf16[72,8], index: 5, kind: input, shape index: {}]   ;;  %s1605_s6 = inlined_call_operand.vmem [shape: bf16[2,8,8,8], index: 6, kind: output, shape index: {0}]   ;;  %s1606_s7 = inlined_call_operand.vmem [shape: f32[2,2,8], index: 7, kind: output, shape index: {1}]  }
   0x1   :  { %s1289_s26 = smov 0   ;;  %s1291_s27 = smov 0  }
   0x2   :  { %s1293_s28 = smov 0  }
   0x3 LB: > { %s27_s29 = sadd.s32 1, %s1226_s26  ;;  %s30_s30 = sadd.s32 1, %s1230_s27  ;;  %s1234_s28 = sphi %s1293_s28, %s18_s28   ;;  %s1230_s27 = sphi %s1291_s27, %s1617_s27   ;;  %s1226_s26 = sphi %s1289_s26, %s1616_s26   ;;  %s1222_s25 = sphi %s1287_s25, %s1615_s25   ;;  %s1218_s24 = sphi %s1285_s24, %s1614_s24  }
   0x4   : > { %p28_p0 = scmp.ge.s32.totalorder %s27_s29, 2  ;;  %p1081_p1 = scmp.ge.s32.totalorder %s1234_s28, 1 }
   0x5   : > { %p323_p2 = scmp.lt.s32.totalorder %s1234_s28, 5 }
   0x6   : > { %s1619_s29 = smov (%p28_p0, %s27_s29), 0  ;;  %s1621_s30 = smov (!%p28_p0, %s30_s30), %s1230_s27 }
   0x7   : > { %p324_p3 = pnand %p1081_p1, %p323_p2  ;;  %p32_p4 = scmp.ge.s32.totalorder %s1621_s30, 2 }
   0x8   : > { %s1318_s8 = sshll.u32 (!%p324_p3), %s1218_s24, 2  ;;  %p392_p5 = scmp.lt.s32.totalorder (!%p324_p3), %s1222_s25, 1 }
   0x9   : > { %s1623_s30 = smov (%p32_p4, %s1621_s30), 0  ;;  %327 = sbr.rel (%p324_p3) target bundleno = 397 (0x18d), region = 44 }
   0xa   : > { %1607 = sst [smem:[#allocation2_spill]] %s1623_s30  ;;  %p394_p6 = scmp.lt.s32.totalorder (!%p324_p3), %s1318_s8, 7 }
   0xb   : > { %p492_p7 = scmp.gt.s32.totalorder (!%p324_p3), %s1218_s24, 0  ;;  %p513_p12 = scmp.lt.s32.totalorder (!%p324_p3), %s1218_s24, 1 }
   0xc   : > { %p1122_p0 = scmp.ne.s32.totalorder (!%p324_p3), %s1218_s24, 0 }
   0xe   : > { %s1625_s25 = smov (!%p392_p5, %s1222_s25), 1  ;;  %v1341_v0 = vld [vmem:[%s1602_s3] ss:$0 sm:$0xff]  ;;  %vm598_vm0 = vsmask.f32 3328  ;;  %vm597_vm1 = vcmask 1043456  }
   0xf   : > { %s395_s9 = scalar_select %p394_p6, %s1318_s8, 7  ;;  %v1346_v4 = vld [vmem:[%s1603_s4] ss:$0 sm:$0xff]  ;;  %vm1390_vm2 = vmand %vm597_vm1, %vm598_vm0  ;;  %vm578_vm3 = vcmask 1040384   ;;  %vm579_vm4 = vsmask.f32 256 }
  0x10   : > { %s1322_s10 = sshll.u32 %s1625_s25, 3  ;;  %s1103_s11 = sshll.u32 %s1625_s25, 1  ;;  %vm1422_vm5 = vmand %vm578_vm3, %vm579_vm4  ;;  %vm711_vm6 = vcmask 64512   ;;  %vm724_vm7 = vcmask 130048   ;;  %vm733_vm8 = vcmask 195584   ;;  %vm742_vm9 = vcmask 261120  }
  0x11   : > { %s397_s12 = sadd.s32 %s1322_s10, %s395_s9  ;;  %s1328_s15 = scalar_lea.vmem %s1606_s7, %s1103_s11  ;;  %vm751_vm10 = vcmask 326656   ;;  %vm760_vm11 = vcmask 392192   ;;  %vm769_vm12 = vcmask 457728   ;;  %vm778_vm13 = vcmask 523264  }
  0x12   : > { %s1084_s16 = sshll.u32 %s397_s12, 2  ;;  %s1086_s11 = sadd.s32 4294967295, %s1318_s8  ;;  %vm833_vm14 = vcmask 588800  }
  0x13   : > { %s399_s19 = scalar_lea.vmem %s1599_s0, %s1084_s16  ;;  %s1336_s22 = scalar_lea.vmem %s1605_s6, %s1084_s16 }
  0x14   : > { %v1132_v1 = vld [vmem:[%s399_s19] sm:$0xff]   ;;  %v1139_v2 = vld [vmem:[%s399_s19 + $0x8] sm:$0xff]   ;;  %p403_p8 = scmp.gt.s32.totalorder %s1086_s11, 0  ;;  %p1087_p9 = scmp.lt.s32.totalorder %s1086_s11, 7 }
  0x15   : > { %v1134_v3 = vunpack.c.h.bf16 %v1132_v1  ;;  %v1133_v5 = vunpack.c.l.bf16 %v1132_v1  ;;  %v1137_v6 = vunpack.c.l.bf16 %v1139_v2  ;;  %v1138_v7 = vunpack.c.h.bf16 %v1139_v2  ;;  %s493_s30 = scalar_select %p492_p7, 1, 0 }
  0x16   : > { %s1627_s11 = smov (!%p403_p8, %s1086_s11), 0  ;;  %s418_s9 = sadd.s32 4, %s1318_s8 }
  0x17   : > { %v462_v8 = vmul.f32 %v1341_v0, %v1134_v3  ;;  %v461_v9 = vmul.f32 %v1341_v0, %v1133_v5  ;;  %v463_v10 = vmul.f32 %v1341_v0, %v1137_v6  ;;  %v464_v11 = vmul.f32 %v1341_v0, %v1138_v7  ;;  %s494_s12 = scvt.s32.f32 %s493_s30  ;;  %s1629_s11 = smov (!%p1087_p9, %s1627_s11), 7 }
  0x18   : > { %s410_s14 = sadd.s32 %s1629_s11, %s1322_s10  ;;  %p1371_p11 = scmp.lt.s32.totalorder %s418_s9, 7 }
  0x19   : > { %v469_v12 = vadd.f32 %v1346_v4, %v462_v8  ;;  %v468_v13 = vadd.f32 %v1346_v4, %v461_v9  ;;  %v470_v14 = vadd.f32 %v1346_v4, %v463_v10  ;;  %v471_v15 = vadd.f32 %v1346_v4, %v464_v11  ;;  %p496_p10 = scmp.ne.f32.partialorder %s494_s12, %s494_s12  ;;  %s497_s13 = sshrl.u32 %s494_s12, 16 }
  0x1a   : > { %s498_s16 = sand.u32 1, %s497_s13  ;;  %s1093_s17 = sshll.u32 %s410_s14, 2 }
  0x1b   : > { %v473_v16 = vmax.f32 %v469_v12, 0.0  ;;  %v472_v17 = vmax.f32 %v468_v13, 0.0  ;;  %v474_v18 = vmax.f32 %v470_v14, 0.0  ;;  %s499_s18 = sadd.s32 32767, %s498_s16  ;;  %v475_v22 = vmax.f32 %v471_v15, 0.0  ;;  %s412_s21 = scalar_lea.vmem %s1600_s1, %s1093_s17 }
  0x1c   : > { %s500_s23 = sadd.s32 %s499_s18, %s494_s12  ;;  %v480_v26 = vld [vmem:[%s412_s21] sm:$0xf]  ;;  %s1236_s12 = smov 8  }
  0x1d   : > { %v477_v19 = vpack.c.bf16 %v473_v16, %v473_v16  ;;  %v476_v20 = vpack.c.bf16 %v472_v17, %v472_v17  ;;  %v478_v21 = vpack.c.bf16 %v474_v18, %v474_v18  ;;  %s501_s25 = sand.u32 4294901760, %s500_s23  ;;  %v481_v27 = vunpack.c.l.bf16 %v480_v26  ;;  %s1633_s9 = smov (!%p1371_p11, %s418_s9), 7 }
  0x1e   : > { %s1631_s25 = smov (%p496_p10, %s501_s25), 2143289344  ;;  %v479_v31 = vpack.c.bf16 %v475_v22, %v475_v22  ;;  %s1635_s9 = smov (!%p1371_p11, %s1633_s9), 7 }
  0x1f   : > { %v540_v23 = vunpack.c.l.b16 %v477_v19  ;;  %v539_v24 = vunpack.c.l.b16 %v476_v20  ;;  %v541_v25 = vunpack.c.l.b16 %v478_v21  ;;  %v482_v32 = vmul.f32 %v1341_v0, %v481_v27  ;;  %s504_s11 = sshrl.u32 %s1631_s25, 16  ;;  %s426_s17 = sadd.s32 %s1322_s10, %s1635_s9 }
  0x20   : > { %s505_s8 = sshll.u32 %s504_s11, 16  ;;  %v605_v40 = vunpack.c.l.b16 %v479_v31  ;;  %s1099_s18 = sshll.u32 %s426_s17, 2 }
  0x21   : > { %v1363_v28 = vpack.c.b16 %v540_v23, %v540_v23  ;;  %v1365_v29 = vpack.c.b16 %v539_v24, %v539_v24  ;;  %v1367_v30 = vpack.c.b16 %v541_v25, %v541_v25  ;;  %v483_v38 = vadd.f32 %v1346_v4, %v482_v32  ;;  %s506_s13 = sor.u32 %s505_s8, %s504_s11  ;;  %s1237_s19 = smov 16  }
  0x22   : > { %s514_s14 = scalar_select %p513_p12, 1, 0  ;;  %v507_v50 = vstv %s506_s13  ;;  %v1405_v53 = vpack.c.b16 %v605_v40, %v605_v40 }
  0x23   : > { %640 = vrot.lane.b32.xlu1 %v1363_v28, %s1236_s12  ;;  %638 = vrot.lane.b32.xlu0 %v1365_v29, %s1236_s12  ;;  %v561_v33 = vshrl.u32 %v1363_v28, 16  ;;  %v564_v34 = vshll.u32 %v1363_v28, 16  ;;  %v571_v35 = vshll.u32 %v1367_v30, 16  ;;  %v554_v36 = vshrl.u32 %v1365_v29, 16  ;;  %s428_s25 = scalar_lea.vmem %s1601_s2, %s1099_s18  ;;  %s1238_s8 = smov 24  }
  0x24   : > { %v557_v37 = vshll.u32 %v1365_v29, 16  ;;  %v484_v43 = vmax.f32 %v483_v38, 0.0  ;;  %v568_v45 = vshrl.u32 %v1367_v30, 16  ;;  %s1399_s16 = scvt.s32.f32 %s514_s14  ;;  %v510_v56 = vunpack.c.l.bf16 %v507_v50  ;;  %v486_v3 = vld [vmem:[%s428_s25] sm:$0xf]  ;;  %s1240_s18 = smov 40  }
  0x25   : > { %v589_v39 = vrot.slane %v564_v34, 1  ;;  %v591_v46 = vrot.slane %v571_v35, 1  ;;  %v563_v47 = vrot.slane %v561_v33, 7  ;;  %v556_v52 = vrot.slane %v554_v36, 7 }
  0x26   : > { %v587_v42 = vrot.slane %v557_v37, 1  ;;  %v485_v49 = vpack.c.bf16 %v484_v43, %v484_v43  ;;  %s518_s20 = sshrl.u32 %s1399_s16, 16  ;;  %p517_p13 = scmp.ne.f32.partialorder %s1399_s16, %s1399_s16  ;;  %v608_v61 = vshrl.u32 %v1405_v53, 16  ;;  %v570_v2 = vrot.slane %v568_v45, 7 }
  0x27   : > { %v590_v44 = vor.u32 %v589_v39, %v561_v33  ;;  %v592_v57 = vor.u32 %v591_v46, %v568_v45  ;;  %v566_v58 = vor.u32 %v564_v34, %v563_v47  ;;  %s519_s10 = sand.u32 1, %s518_s20  ;;  %v559_v60 = vor.u32 %v557_v37, %v556_v52  ;;  %s1243_s20 = smov 64  }
  0x28   : > { %v588_v48 = vor.u32 %v587_v42, %v554_v36  ;;  %v509_v55 = vunpack.c.l.bf16 %v485_v49  ;;  %s520_s9 = sadd.s32 32767, %s519_s10  ;;  %v610_v6 = vrot.slane %v608_v61, 7  ;;  %v611_v7 = vshll.u32 %v1405_v53, 16 }
  0x29   : > { %v1403_v51 = vsel %vm1390_vm2, %v590_v44, 0  ;;  %s521_s11 = sadd.s32 %s520_s9, %s1399_s16  ;;  %v1433_v63 = vsel %vm1390_vm2, %v592_v57, 0  ;;  %v1437_v1 = vsel %vm1422_vm5, 0, %v566_v58  ;;  %v1441_v5 = vsel %vm1422_vm5, 0, %v559_v60  ;;  %s1239_s16 = smov 32  }
  0x2a   : > { %v1410_v54 = vsel %vm1390_vm2, %v588_v48, 0  ;;  %v511_v62 = vmul.f32 %v510_v56, %v509_v55  ;;  %s522_s30 = sand.u32 4294901760, %s521_s11  ;;  %v487_v8 = vunpack.c.l.bf16 %v486_v3  ;;  %v573_v11 = vor.u32 %v571_v35, %v570_v2  ;;  %v795_v56 = vld [vmem:[%s1604_s5 + $0x20] sm:$0xf] }
  0x2b   : > { %642 = vrot.lane.b32.xlu1 %v1367_v30, %s1236_s12  ;;  %652 = vrot.lane.b32.xlu0 %v1403_v51, %s1237_s19  ;;  %s1637_s30 = smov (%p517_p13, %s522_s30), 2143289344  ;;  %v613_v12 = vor.u32 %v611_v7, %v610_v6  ;;  %v616_v26 = vrot.slane %v611_v7, 1  ;;  %v823_v57 = vunpack.c.l.b16 %v795_v56  ;;  %v1128_v6 = vld [vmem:[%s1604_s5 + $0x8] sm:$0xff] }
  0x2c   : > { %650 = vrot.lane.b32.xlu2 %v1410_v54, %s1237_s19  ;;  %v512_v9 = vpack.c.bf16 %v511_v62, %v511_v62  ;;  %v488_v10 = vmul.f32 %v1341_v0, %v487_v8  ;;  %s525_s13 = sshrl.u32 %s1637_s30, 16  ;;  %v1457_v15 = vsel %vm1422_vm5, 0, %v573_v11 }
  0x2d   : > { %s526_s14 = sshll.u32 %s525_s13, 16  ;;  %v615_v16 = vsel %vm1422_vm5, 0, %v613_v12  ;;  %v617_v31 = vor.u32 %v616_v26, %v608_v61  ;;  %v828_v61 = vpack.c.b16 %v823_v57, %v823_v57 }
  0x2e   : > { %v489_v13 = vadd.f32 %v1346_v4, %v488_v10  ;;  %v538_v14 = vunpack.c.l.b16 %v512_v9  ;;  %s527_s17 = sor.u32 %s526_s14, %s525_s13  ;;  %v1127_v10 = vld [vmem:[%s1604_s5] sm:$0xff] }
  0x2f   : > { %v528_v19 = vstv %s527_s17  ;;  %v619_v33 = vsel %vm1390_vm2, %v617_v31, 0  ;;  %v842_v62 = vsel %vm597_vm1, %v828_v61, 0 }
  0x30   : > { %v490_v17 = vmax.f32 %v489_v13, 0.0  ;;  %v1463_v0 = vpack.c.b16 %v538_v14, %v538_v14  ;;  %v531_v23 = vunpack.c.l.bf16 %v528_v19  ;;  %847 = vmatpush.bf16.msra.mxu0 %v842_v62  ;;  %1140 = vmatpush.bf16.msra.mxu1 %v842_v62 }
  0x32   : > { %v550_v4 = vshll.u32 %v1463_v0, 16  ;;  %v491_v18 = vpack.c.bf16 %v490_v17, %v490_v17  ;;  %v547_v20 = vshrl.u32 %v1463_v0, 16 }
  0x33   : > { %654 = vrot.lane.b32.xlu1 %v1433_v63, %s1237_s19  ;;  %662 = vrot.lane.b32.xlu0 %v1437_v1, %s1238_s8 }
  0x34   : > { %660 = vrot.lane.b32.xlu2 %v1441_v5, %s1238_s8  ;;  %v585_v21 = vrot.slane %v550_v4, 1  ;;  %v530_v22 = vunpack.c.l.bf16 %v491_v18  ;;  %v549_v11 = vrot.slane %v547_v20, 7 }
  0x36   : > { %v586_v24 = vor.u32 %v585_v21, %v547_v20  ;;  %v532_v25 = vmul.f32 %v531_v23, %v530_v22 }
  0x38   : > { %v600_v27 = vsel %vm1390_vm2, %v586_v24, 0 }
  0x3b   : > { %664 = vrot.lane.b32.xlu1 %v1457_v15, %s1238_s8  ;;  %668 = vrot.lane.b32.xlu0 %v1365_v29, %s1239_s16  ;;  %v533_v29 = vpack.c.bf16 %v532_v25, %v532_v25 }
  0x3c   : > { %666 = vrot.lane.b32.xlu2 %v615_v16, %s1238_s8 }
  0x3d   : > { %v621_v32 = vunpack.c.l.b16 %v533_v29 }
  0x3f   : > { %v622_v34 = vpack.c.b16 %v621_v32, %v621_v32 }
  0x41   : > { %v624_v35 = vshrl.u32 %v622_v34, 16  ;;  %v627_v37 = vshll.u32 %v622_v34, 16 }
  0x43   : > { %670 = vrot.lane.b32.xlu1 %v1363_v28, %s1239_s16  ;;  %636 = vrot.lane.b32.xlu0 %v1463_v0, %s1236_s12  ;;  %v626_v36 = vrot.slane %v624_v35, 7  ;;  %s1241_s12 = smov 48   ;;  %v632_v40 = vrot.slane %v627_v37, 1 }
  0x44   : > { %672 = vrot.lane.b32.xlu2 %v1367_v30, %s1239_s16 }
  0x45   : > { %v629_v38 = vor.u32 %v627_v37, %v626_v36  ;;  %v633_v42 = vor.u32 %v632_v40, %v624_v35 }
  0x47   : > { %v631_v39 = vsel %vm1422_vm5, 0, %v629_v38  ;;  %v635_v43 = vsel %vm1390_vm2, %v633_v42, 0 }
  0x4b   : > { %674 = vrot.lane.b32.xlu0 %v1405_v53, %s1239_s16  ;;  %677 = vrot.lane.b32.xlu1 %v1410_v54, %s1240_s18 }
  0x4c   : > { %648 = vrot.lane.b32.xlu2 %v600_v27, %s1237_s19  ;;  %s1242_s19 = smov 56  }
  0x53   : > { %681 = vrot.lane.b32.xlu0 %v1433_v63, %s1240_s18  ;;  %683 = vrot.lane.b32.xlu1 %v619_v33, %s1240_s18 }
  0x54   : > { %679 = vrot.lane.b32.xlu2 %v1403_v51, %s1240_s18 }
  0x5b   : > { %688 = vrot.lane.b32.xlu0 %v1457_v15, %s1241_s12  ;;  %690 = vrot.lane.b32.xlu1 %v615_v16, %s1241_s12  ;;  %v552_v16 = vor.u32 %v550_v4, %v549_v11 }
  0x5c   : > { %686 = vrot.lane.b32.xlu2 %v1437_v1, %s1241_s12 }
  0x5d   : > { %v581_v17 = vsel %vm1422_vm5, 0, %v552_v16 }
  0x63   : > { %694 = vrot.lane.b32.xlu0 %v1363_v28, %s1242_s19  ;;  %696 = vrot.lane.b32.xlu1 %v1367_v30, %s1242_s19 }
  0x64   : > { %692 = vrot.lane.b32.xlu2 %v631_v39, %s1241_s12 }
  0x6b   : > { %700 = vrot.lane.b32.xlu0 %v622_v34, %s1242_s19  ;;  %703 = vrot.lane.b32.xlu1 %v1403_v51, %s1243_s20 }
  0x6c   : > { %698 = vrot.lane.b32.xlu2 %v1405_v53, %s1242_s19 }
  0x73   : > { %707 = vrot.lane.b32.xlu0 %v619_v33, %s1243_s20  ;;  %709 = vrot.lane.b32.xlu1 %v635_v43, %s1243_s20 }
  0x74   : > { %705 = vrot.lane.b32.xlu2 %v1433_v63, %s1243_s20 }
  0x86   : > { %v651_v44 = vpop.permute.xlu2 %650 }
  0x8e   : > { %v661_v28 = vpop.permute.xlu2 %660 }
  0x95   : > { %v641_v30 = vpop.permute.xlu1 %640  ;;  %v639_v45 = vpop.permute.xlu0 %638 }
  0x96   : > { %v717_v46 = vsel %vm711_vm6, %v1441_v5, %v639_v45  ;;  %v1497_v47 = vpop.permute.xlu2 %666  ;;  %v720_v41 = vsel %vm711_vm6, %v1437_v1, %v641_v30  ;;  %v1130_v1 = vld [vmem:[%s1604_s5 + $0x18] sm:$0xff]  ;;  %v1129_v5 = vld [vmem:[%s1604_s5 + $0x10] sm:$0xff] }
  0x97   : > { %v728_v48 = vsel %vm724_vm7, %v717_v46, %v651_v44  ;;  %848 = vmatpush.bf16.msra.mxu0 %v1130_v1  ;;  %1141 = vmatpush.bf16.msra.mxu1 %v1130_v1 }
  0x9b   : > { %849 = vmatpush.bf16.msra.mxu0 %v1129_v5  ;;  %1142 = vmatpush.bf16.msra.mxu1 %v1129_v5 }
  0x9d   : > { %v643_v49 = vpop.permute.xlu1 %642  ;;  %v653_v50 = vpop.permute.xlu0 %652 }
  0x9e   : > { %v1503_v51 = vsel %vm724_vm7, %v720_v41, %v653_v50  ;;  %v1505_v52 = vpop.permute.xlu2 %672  ;;  %v723_v33 = vsel %vm711_vm6, %v1457_v15, %v643_v49 }
  0x9f   : > { %850 = vmatpush.bf16.msra.mxu0 %v1128_v6  ;;  %1143 = vmatpush.bf16.msra.mxu1 %v1128_v6 }
  0xa3   : > { %851 = vmatpush.bf16.msra.mxu0 %v1127_v10  ;;  %1144 = vmatpush.bf16.msra.mxu1 %v1127_v10 }
  0xa5   : > { %v655_v53 = vpop.permute.xlu1 %654  ;;  %v663_v54 = vpop.permute.xlu0 %662 }
  0xa6   : > { %v649_v55 = vpop.permute.xlu2 %648  ;;  %v737_v24 = vsel %vm733_vm8, %v728_v48, %v663_v54  ;;  %v732_v34 = vsel %vm724_vm7, %v723_v33, %v655_v53 }
  0xa7   : > { %v741_v43 = vsel %vm733_vm8, %v732_v34, %v1497_v47 }
  0xad   : > { %v665_v58 = vpop.permute.xlu1 %664  ;;  %v669_v60 = vpop.permute.xlu0 %668 }
  0xae   : > { %v680_v63 = vpop.permute.xlu2 %679  ;;  %v739_v37 = vsel %vm733_vm8, %v1503_v51, %v665_v58 }
  0xaf   : > { %v748_v30 = vsel %vm742_vm9, %v739_v37, %v1505_v52 }
  0xb5   : > { %v671_v2 = vpop.permute.xlu1 %670  ;;  %v637_v3 = vpop.permute.xlu0 %636 }
  0xb6   : > { %v687_v7 = vpop.permute.xlu2 %686  ;;  %v714_v21 = vsel %vm711_vm6, %v581_v17, %v637_v3  ;;  %v746_v20 = vsel %vm742_vm9, %v737_v24, %v671_v2 }
  0xb7   : > { %v726_v23 = vsel %vm724_vm7, %v714_v21, %v649_v55  ;;  %v755_v59 = vsel %vm751_vm10, %v746_v20, %v680_v63 }
  0xb8   : > { %v735_v0 = vsel %vm733_vm8, %v726_v23, %v661_v28 }
  0xb9   : > { %v744_v26 = vsel %vm742_vm9, %v735_v0, %v669_v60 }
  0xbd   : > { %v675_v8 = vpop.permute.xlu0 %674  ;;  %v678_v9 = vpop.permute.xlu1 %677 }
  0xbe   : > { %v693_v12 = vpop.permute.xlu2 %692  ;;  %v753_v29 = vsel %vm751_vm10, %v744_v26, %v678_v9  ;;  %v750_v28 = vsel %vm742_vm9, %v741_v43, %v675_v8 }
  0xbf   : > { %v762_v35 = vsel %vm760_vm11, %v753_v29, %v687_v7 }
  0xc5   : > { %v682_v13 = vpop.permute.xlu0 %681  ;;  %v684_v14 = vpop.permute.xlu1 %683 }
  0xc6   : > { %v699_v22 = vpop.permute.xlu2 %698  ;;  %v757_v45 = vsel %vm751_vm10, %v748_v30, %v682_v13  ;;  %v759_v46 = vsel %vm751_vm10, %v750_v28, %v684_v14 }
  0xc7   : > { %v768_v49 = vsel %vm760_vm11, %v759_v46, %v693_v12 }
  0xcd   : > { %v689_v18 = vpop.permute.xlu0 %688  ;;  %v691_v19 = vpop.permute.xlu1 %690 }
  0xce   : > { %v764_v27 = vsel %vm760_vm11, %v755_v59, %v689_v18  ;;  %v706_v32 = vpop.permute.xlu2 %705  ;;  %v766_v41 = vsel %vm760_vm11, %v757_v45, %v691_v19 }
  0xcf   : > { %v775_v47 = vsel %vm769_vm12, %v766_v41, %v699_v22 }
  0xd5   : > { %v695_v4 = vpop.permute.xlu0 %694  ;;  %v697_v25 = vpop.permute.xlu1 %696 }
  0xd6   : > { %v773_v31 = vsel %vm769_vm12, %v764_v27, %v697_v25  ;;  %v771_v38 = vsel %vm769_vm12, %v762_v35, %v695_v4 }
  0xd7   : > { %v782_v36 = vsel %vm778_vm13, %v773_v31, %v706_v32 }
  0xd8   : > { %v801_v44 = vunpack.c.l.b16 %v782_v36 }
  0xdd   : > { %v701_v39 = vpop.permute.xlu0 %700  ;;  %v704_v40 = vpop.permute.xlu1 %703 }
  0xde   : > { %v780_v42 = vsel %vm778_vm13, %v771_v38, %v704_v40  ;;  %v777_v50 = vsel %vm769_vm12, %v768_v49, %v701_v39 }
  0xdf   : > { %v800_v15 = vunpack.c.l.b16 %v780_v42 }
  0xe1   : > { %v804_v48 = vpack.c.b16 %v801_v44, %v800_v15 }
  0xe3   : > { %1120 = vmatmul.msk.bf16.vlgmr.msra.gmra.mxu0 %vm833_vm14, %v804_v48 }
  0xe5   : > { %v708_v51 = vpop.permute.xlu0 %707  ;;  %v710_v53 = vpop.permute.xlu1 %709 }
  0xe6   : > { %v784_v52 = vsel %vm778_vm13, %v775_v47, %v708_v51  ;;  %v786_v54 = vsel %vm778_vm13, %v777_v50, %v710_v53 }
  0xe7   : > { %v802_v55 = vunpack.c.l.b16 %v784_v52  ;;  %v803_v56 = vunpack.c.l.b16 %v786_v54 }
  0xe9   : > { %v805_v57 = vpack.c.b16 %v803_v56, %v802_v55 }
  0xeb   : > { %1121 = vmatmul.msk.bf16.vlgmr.msra.gmra.mxu1 %vm833_vm14, %v805_v57 }
 0x160   : > { %v853_v58 = vpop.f32.mrf.mxu0 }
 0x168   : > { %v855_v60 = vpop.f32.mrf.mxu0  ;;  %v858_v61 = vpop.f32.mrf.mxu1 }
 0x16c   : > { %866 = sbr.rel (%p1122_p0) target bundleno = 371 (0x173), region = 48 }
 0x170   : > { %v860_v62 = vpop.f32.mrf.mxu1 }
 0x171   : > { %vm867_vm15 = vcmask 58368   ;;  %v1244_v63 = vmov 0.0  }
 0x172   : > { %868 = vst.msk [vmem:[%s1328_s15] sm:$0x3] %vm867_vm15, %v1244_v63 }
 0x173 PF: > { %v870_v1 = vsel %vm711_vm6, %v853_v58, 0.0  ;;  %v871_v2 = vsel %vm711_vm6, %v855_v60, 0.0  ;;  %v873_v3 = vsel %vm711_vm6, %v858_v61, 0.0  ;;  %v883_v6 = vmul.f32 %v853_v58, %v853_v58 }
 0x174   : > { %v872_v5 = vadd.f32 %v871_v2, %v870_v1  ;;  %v884_v7 = vmul.f32 %v855_v60, %v855_v60  ;;  %v885_v8 = vmul.f32 %v858_v61, %v858_v61  ;;  %v875_v9 = vsel %vm711_vm6, %v860_v62, 0.0 }
 0x175   : > { %v886_v10 = vmul.f32 %v860_v62, %v860_v62  ;;  %v905_v11 = vpack.c.bf16 %v853_v58, %v853_v58  ;;  %vm909_vm0 = vcmask 60416   ;;  %v887_v13 = vsel %vm711_vm6, %v883_v6, 0.0 }
 0x176   : > { %v874_v12 = vadd.f32 %v873_v3, %v872_v5  ;;  %v888_v14 = vsel %vm711_vm6, %v884_v7, 0.0  ;;  %v890_v16 = vsel %vm711_vm6, %v885_v8, 0.0  ;;  %v906_v18 = vpack.c.bf16 %v855_v60, %v855_v60 }
 0x177   : > { %v889_v17 = vadd.f32 %v888_v14, %v887_v13  ;;  %910 = vst.msk [vmem:[%s1336_s22] sm:$0xf] %vm909_vm0, %v905_v11  ;;  %v907_v19 = vpack.c.bf16 %v858_v61, %v858_v61  ;;  %v892_v22 = vsel %vm711_vm6, %v886_v10, 0.0  ;;  %v908_v23 = vpack.c.bf16 %v860_v62, %v860_v62 }
 0x178   : > { %v876_v21 = vadd.f32 %v875_v9, %v874_v12  ;;  %911 = vst.msk [vmem:[%s1336_s22 + $0x4] sm:$0xf] %vm909_vm0, %v906_v18  ;;  %vm903_vm1 = vcmask 58368  }
 0x179   : > { %v891_v24 = vadd.f32 %v890_v16, %v889_v17  ;;  %912 = vst.msk [vmem:[%s1336_s22 + $0x8] sm:$0xf] %vm909_vm0, %v907_v19  ;;  %v869_v35 = vld [vmem:[%s1328_s15] sm:$0x3] }
 0x17a   : > { %v877_v20 = vrot.slane %v876_v21, 4  ;;  %913 = vst.msk [vmem:[%s1336_s22 + $0xc] sm:$0xf] %vm909_vm0, %v908_v23 }
 0x17b   : > { %v893_v0 = vadd.f32 %v892_v22, %v891_v24 }
 0x17c   : > { %v878_v4 = vadd.f32 %v877_v20, %v876_v21 }
 0x17d   : > { %v894_v25 = vrot.slane %v893_v0, 4 }
 0x17e   : > { %v879_v59 = vrot.slane %v878_v4, 2 }
 0x17f   : > { %v895_v26 = vadd.f32 %v894_v25, %v893_v0 }
 0x180   : > { %v880_v27 = vadd.f32 %v879_v59, %v878_v4 }
 0x181   : > { %v896_v29 = vrot.slane %v895_v26, 2 }
 0x182   : > { %v881_v31 = vrot.slane %v880_v27, 1 }
 0x183   : > { %v897_v32 = vadd.f32 %v896_v29, %v895_v26 }
 0x184   : > { %v882_v33 = vadd.f32 %v881_v31, %v880_v27 }
 0x185   : > { %v898_v34 = vrot.slane %v897_v32, 1 }
 0x187   : > { %v899_v36 = vadd.f32 %v898_v34, %v897_v32 }
 0x189   : > { %v901_v37 = vsel %vm578_vm3, %v882_v33, %v899_v36 }
 0x18a   : > { %v902_v38 = vadd.f32 %v901_v37, %v869_v35 }
 0x18c   : > { %904 = vst.msk [vmem:[%s1328_s15] sm:$0x3] %vm903_vm1, %v902_v38 }
 0x18d PF: > { %s18_s28 = sadd.s32 1, %s1234_s28   ;;  %s1613_s22 = sld [smem:[#allocation2_spill]] }
 0x18e   : > { %p15_p1 = scmp.ge.s32.totalorder %s18_s28, 6   ;;  %s1614_s24 = smov %s1226_s26 }
 0x18f   : > { %s1615_s25 = smov %s1230_s27  ;;  %s1616_s26 = smov %s1619_s29 }
 0x190   :  { %17 = sbr.rel (!%p15_p1) target bundleno = 3 (0x3), region = 96 }
 0x193   : > { %s1617_s27 = smov %s1613_s22 }

</bundles_post_ra>
